<compile_context>
chip_gen: v7x
topology: tpu7x:2x2x1
jax: 0.10.0
libtpu: 0.0.40
codegen_flags: <defaults>
</compile_context>

<pallas_src>
import math

import jax
import jax.numpy as jnp
from jax.experimental import pallas as pl
from jax.experimental.pallas import tpu as pltpu

# ----------------------------- model config ---------------------------------
NUM_CHANNELS = 3
IMAGE_SIZE   = 16
PATCH_SIZE   = 4
HIDDEN       = 32
NUM_HEADS    = 2
HEAD_DIM     = HIDDEN // NUM_HEADS
INTERMEDIATE = 64
NUM_LAYERS   = 2
NUM_CLASSES  = 10
LN_EPS       = 1e-12

NUM_PATCHES  = (IMAGE_SIZE // PATCH_SIZE) ** 2          # 16
SEQ_LEN      = NUM_PATCHES + 1                          # 17 (with CLS)
SEQ_PAD      = 24                                       # 8-sublane aligned
PATCH_DIM    = NUM_CHANNELS * PATCH_SIZE * PATCH_SIZE   # 48
CLS_PAD      = 128                                      # lane-dense logits slab
NEG_INF      = -1e30

# bf16 matmul operands (f32 accumulate) per review; use jnp.float32 for parity.
MATMUL_DTYPE = jnp.bfloat16

# Row offsets inside the packed (NUM_LAYERS, 192, HIDDEN) weight slab.
_ROW_WQ = 0
_ROW_WK = HIDDEN
_ROW_WV = 2 * HIDDEN
_ROW_WO = 3 * HIDDEN
_ROW_W2 = 4 * HIDDEN            # w2 occupies rows 128..191 (INTERMEDIATE rows)


# ----------------------------- kernel helpers --------------------------------
def _normalize(x, eps=LN_EPS):
    """LayerNorm without affine (gamma/beta are folded into the next matmul)."""
    mu = jnp.mean(x, axis=-1, keepdims=True)
    xc = x - mu
    var = jnp.mean(xc * xc, axis=-1, keepdims=True)
    return xc * jax.lax.rsqrt(var + eps)


def _erf(x):
    # Abramowitz & Stegun 7.1.26 polynomial (|err| <= 1.5e-7); exp -> EUP slot.
    a1, a2, a3, a4, a5 = 0.254829592, -0.284496736, 1.421413741, -1.453152027, 1.061405429
    p = 0.3275911
    sgn = jnp.where(x >= 0.0, 1.0, -1.0)
    ax = jnp.abs(x)
    t = 1.0 / (1.0 + p * ax)
    poly = ((((a5 * t + a4) * t + a3) * t + a2) * t + a1) * t
    return sgn * (1.0 - poly * jnp.exp(-ax * ax))


def _gelu(x):
    # Exact (erf) GELU, matching HF ViT's default activation.
    return 0.5 * x * (1.0 + _erf(x * (1.0 / math.sqrt(2.0))))


# ----------------------------- fused Pallas kernel ----------------------------
def vit_kernel(patch_ref, tok_ref, pw_ref, w32_ref, w64_ref, b32_ref, b64_ref,
               wc_ref, bc_ref, out_ref):
    """One grid step == one image: (SEQ_PAD, HIDDEN) token slab end-to-end."""
    f32 = jnp.float32
    mm = MATMUL_DTYPE

    def dot(a, b):
        return jnp.dot(a.astype(mm), b.astype(mm), preferred_element_type=f32)

    # --- patch embedding + token assembly ------------------------------------
    # patch rows for CLS / pad positions are zero, so one dense matmul plus the
    # precomputed token table (cls+pos[0] / pos[i]+patch_b / 0) is exact.
    x = dot(patch_ref[...], pw_ref[...]) + tok_ref[...]          # (SEQ_PAD, HIDDEN)

    # --- masks built in-kernel from iota (no O(B^2) bias input) --------------
    col = jax.lax.broadcasted_iota(jnp.int32, (SEQ_PAD, SEQ_PAD), 1)
    bias = jnp.where(col < SEQ_LEN, f32(0.0), f32(NEG_INF))      # key-padding mask
    lane = jax.lax.broadcasted_iota(jnp.int32, (1, HIDDEN), 1)
    head_masks = [((lane >= hi * HEAD_DIM) & (lane < (hi + 1) * HEAD_DIM)).astype(f32)
                  for hi in range(NUM_HEADS)]                    # hoisted, computed once

    # --- transformer encoder layers (static unrolled loop) -------------------
    for li in range(NUM_LAYERS):
        # pre-LN MHSA; LN affine + 1/sqrt(head_dim) folded into wq/wk/wv/bq/bk/bv
        xn = _normalize(x)
        q = dot(xn, w32_ref[li, _ROW_WQ:_ROW_WQ + HIDDEN, :]) + b32_ref[li, 0:1, :]
        k = dot(xn, w32_ref[li, _ROW_WK:_ROW_WK + HIDDEN, :]) + b32_ref[li, 1:2, :]
        v = dot(xn, w32_ref[li, _ROW_WV:_ROW_WV + HIDDEN, :]) + b32_ref[li, 2:3, :]
        k_mm = k.astype(mm)

        ctx = jnp.zeros((SEQ_PAD, HIDDEN), f32)
        for hi in range(NUM_HEADS):
            m = head_masks[hi]                                   # (1, HIDDEN) lane mask
            # (q*m) @ k.T == q_h @ k_h.T (other head's columns zeroed)
            logits = jax.lax.dot_general(
                (q * m).astype(mm), k_mm, (((1,), (1,)), ((), ())),
                preferred_element_type=f32) + bias               # (SEQ_PAD, SEQ_PAD)
            logits = logits - jnp.max(logits, axis=-1, keepdims=True)
            p = jnp.exp(logits)
            p = p / jnp.sum(p, axis=-1, keepdims=True)           # exact divide (parity)
            # p @ (v*m) lands head-h context in head-h columns only
            ctx = ctx + dot(p, v * m)

        # single full output projection (== concat(ctx_h) @ wo)
        x = x + dot(ctx, w32_ref[li, _ROW_WO:_ROW_WO + HIDDEN, :]) + b32_ref[li, 3:4, :]

        # pre-LN MLP; LN affine folded into w1/b1
        xn2 = _normalize(x)
        hmid = _gelu(dot(xn2, w64_ref[li]) + b64_ref[li])        # (SEQ_PAD, INTERMEDIATE)
        x = x + dot(hmid, w32_ref[li, _ROW_W2:_ROW_W2 + INTERMEDIATE, :]) \
              + b32_ref[li, 4:5, :]

    # --- final LN + classifier on the whole slab (LN affine folded into wc) ---
    # Full 24-row LN+matmul is negligible extra MXU work and makes the only HBM
    # store an unmasked, lane- and sublane-dense (24, 128) tile.
    xn = _normalize(x)
    out_ref[...] = (dot(xn, wc_ref[...]) + bc_ref[...]).astype(out_ref.dtype)


# ----------------------------- wrappers ---------------------------------------
def _extract_patches(x):
    """NCHW image -> (B, num_patches, C*P*P); matches Conv2d(patch, stride=patch)
    with weight flattened as (HIDDEN, C*P*P).T and row-major patch-grid order."""
    B, C, H, W = x.shape
    P = PATCH_SIZE
    xp = x.reshape(B, C, H // P, P, W // P, P)
    xp = xp.transpose(0, 2, 4, 1, 3, 5).reshape(B, (H // P) * (W // P), C * P * P)
    return xp


def _fold_layer(layer, scale):
    """Fold the pre-LN affines (and attention scale) into the adjacent matmuls.
    (xn*g + b) @ W + c  ==  xn @ (diag(g) W) + (b @ W + c)   (exact)."""
    g1 = layer["ln1_g"].reshape(-1, 1)
    b1n = layer["ln1_b"]
    g2 = layer["ln2_g"].reshape(-1, 1)
    b2n = layer["ln2_b"]

    wq = layer["wq"] * g1 * scale
    bq = (b1n @ layer["wq"] + layer["bq"]) * scale
    wk = layer["wk"] * g1
    bk = b1n @ layer["wk"] + layer["bk"]
    wv = layer["wv"] * g1
    bv = b1n @ layer["wv"] + layer["bv"]
    w1 = layer["w1"] * g2
    b1 = b2n @ layer["w1"] + layer["b1"]

    w32 = jnp.concatenate([wq, wk, wv, layer["wo"], layer["w2"]], axis=0)  # (192, 32)
    b32 = jnp.concatenate([bq, bk, bv, layer["bo"], layer["b2"]], axis=0)  # (5, 32)
    return w32, w1, b32, b1


def vit_forward(x, params):
    B = x.shape[0]
    f32 = jnp.float32

    # Patch slab: row 0 (CLS) and rows SEQ_LEN..SEQ_PAD-1 are zero per image.
    patches = _extract_patches(x)                                        # (B, 16, 48)
    patches_pad = jnp.pad(patches, ((0, 0), (1, SEQ_PAD - SEQ_LEN), (0, 0)))
    patches_pad = patches_pad.reshape(B * SEQ_PAD, PATCH_DIM)

    # Token table: cls+pos[0] / pos[i]+patch_b / zeros (patch_b folded here).
    tok = jnp.zeros((SEQ_PAD, HIDDEN), f32)
    tok = tok.at[0:1, :].set(params["cls_token"] + params["pos_emb"][0:1, :])
    tok = tok.at[1:SEQ_LEN, :].set(params["pos_emb"][1:SEQ_LEN, :] + params["patch_b"])

    # Consolidated, LN-folded weight slabs (bf16 matmul operands, f32 biases).
    scale = 1.0 / math.sqrt(HEAD_DIM)
    folded = [_fold_layer(l, scale) for l in params["layers"]]
    w32 = jnp.stack([f[0] for f in folded]).astype(MATMUL_DTYPE)  # (L, 192, 32)
    w64 = jnp.stack([f[1] for f in folded]).astype(MATMUL_DTYPE)  # (L, 32, 64)
    b32 = jnp.stack([f[2] for f in folded]).astype(f32)           # (L, 5, 32)
    b64 = jnp.stack([f[3] for f in folded]).astype(f32)           # (L, 1, 64)
    patch_w = params["patch_w"].astype(MATMUL_DTYPE)

    # Classifier padded to 128 lanes; final-LN affine folded into it (exact).
    wc_pad = jnp.pad(params["cls_w"], ((0, 0), (0, CLS_PAD - NUM_CLASSES)))
    bc_pad = jnp.pad(params["cls_b"], ((0, 0), (0, CLS_PAD - NUM_CLASSES)))
    wc_eff = (wc_pad * params["ln_f_g"].reshape(-1, 1)).astype(MATMUL_DTYPE)
    bc_eff = (params["ln_f_b"] @ wc_pad + bc_pad).astype(f32)

    grid_spec = pltpu.PrefetchScalarGridSpec(
        num_scalar_prefetch=0,
        grid=(B,),
        in_specs=[
            pl.BlockSpec((SEQ_PAD, PATCH_DIM), lambda b: (b, 0)),               # patches
            pl.BlockSpec((SEQ_PAD, HIDDEN), lambda b: (0, 0)),                  # tok table
            pl.BlockSpec((PATCH_DIM, HIDDEN), lambda b: (0, 0)),                # patch_w
            pl.BlockSpec((NUM_LAYERS, 4 * HIDDEN + INTERMEDIATE, HIDDEN),
                         lambda b: (0, 0, 0)),                                  # w32 slab
            pl.BlockSpec((NUM_LAYERS, HIDDEN, INTERMEDIATE), lambda b: (0, 0, 0)),  # w64
            pl.BlockSpec((NUM_LAYERS, 5, HIDDEN), lambda b: (0, 0, 0)),          # b32 slab
            pl.BlockSpec((NUM_LAYERS, 1, INTERMEDIATE), lambda b: (0, 0, 0)),    # b64 slab
            pl.BlockSpec((HIDDEN, CLS_PAD), lambda b: (0, 0)),                   # wc_eff
            pl.BlockSpec((1, CLS_PAD), lambda b: (0, 0)),                        # bc_eff
        ],
        out_specs=pl.BlockSpec((SEQ_PAD, CLS_PAD), lambda b: (b, 0)),
    )

    out = pl.pallas_call(
        vit_kernel,
        out_shape=jax.ShapeDtypeStruct((B * SEQ_PAD, CLS_PAD), f32),
        grid_spec=grid_spec,
        compiler_params=pltpu.CompilerParams(
            dimension_semantics=("parallel",)),   # lets v7x use both TensorCores
    )(patches_pad, tok, patch_w, w32, w64, b32, b64, wc_eff, bc_eff)

    # CLS row of each image, real classes only (lane-dense slab sliced in JAX).
    return out.reshape(B, SEQ_PAD, CLS_PAD)[:, 0, :NUM_CLASSES]


# ----------------------------- param init -------------------------------------
def init_params(key):
    ks = jax.random.split(key, 8 + NUM_LAYERS)
    s = 0.02
    params = {
        "patch_w": jax.random.normal(ks[0], (PATCH_DIM, HIDDEN), jnp.float32) * s,
        "patch_b": jnp.zeros((1, HIDDEN), jnp.float32),
        "cls_token": jax.random.normal(ks[1], (1, HIDDEN), jnp.float32) * s,
        "pos_emb": jax.random.normal(ks[2], (SEQ_LEN, HIDDEN), jnp.float32) * s,
        "ln_f_g": jnp.ones((1, HIDDEN), jnp.float32),
        "ln_f_b": jnp.zeros((1, HIDDEN), jnp.float32),
        "cls_w": jax.random.normal(ks[3], (HIDDEN, NUM_CLASSES), jnp.float32) * s,
        "cls_b": jnp.zeros((1, NUM_CLASSES), jnp.float32),
        "layers": [],
    }
    for li in range(NUM_LAYERS):
        lk = jax.random.split(ks[8 + li], 6)
        params["layers"].append({
            "ln1_g": jnp.ones((1, HIDDEN), jnp.float32),
            "ln1_b": jnp.zeros((1, HIDDEN), jnp.float32),
            "wq": jax.random.normal(lk[0], (HIDDEN, HIDDEN), jnp.float32) * s,
            "bq": jnp.zeros((1, HIDDEN), jnp.float32),
            "wk": jax.random.normal(lk[1], (HIDDEN, HIDDEN), jnp.float32) * s,
            "bk": jnp.zeros((1, HIDDEN), jnp.float32),
            "wv": jax.random.normal(lk[2], (HIDDEN, HIDDEN), jnp.float32) * s,
            "bv": jnp.zeros((1, HIDDEN), jnp.float32),
            "wo": jax.random.normal(lk[3], (HIDDEN, HIDDEN), jnp.float32) * s,
            "bo": jnp.zeros((1, HIDDEN), jnp.float32),
            "ln2_g": jnp.ones((1, HIDDEN), jnp.float32),
            "ln2_b": jnp.zeros((1, HIDDEN), jnp.float32),
            "w1": jax.random.normal(lk[4], (HIDDEN, INTERMEDIATE), jnp.float32) * s,
            "b1": jnp.zeros((1, INTERMEDIATE), jnp.float32),
            "w2": jax.random.normal(lk[5], (INTERMEDIATE, HIDDEN), jnp.float32) * s,
            "b2": jnp.zeros((1, HIDDEN), jnp.float32),
        })
    return params


# ----------------------------- main -------------------------------------------
if __name__ == "__main__":
    key = jax.random.PRNGKey(0)
    pkey, xkey = jax.random.split(key)
    params = init_params(pkey)

    # NCHW input, matching the PyTorch module's expected image tensor layout.
    x = jax.random.normal(xkey, (2, NUM_CHANNELS, IMAGE_SIZE, IMAGE_SIZE),
                          dtype=jnp.float32)

    logits = jax.jit(vit_forward)(x, params)
    logits = jax.block_until_ready(logits)
    assert logits.shape == (2, NUM_CLASSES) and logits.dtype == jnp.float32
    print("KERNEL_OK")
</pallas_src>

<mosaic_0001>
module attributes {stable_mosaic.version = 11 : i64} {
  func.func @vit_kernel(%arg0: i32, %arg1: memref<24x48xf32, #tpu.memory_space<vmem>>, %arg2: memref<24x32xf32, #tpu.memory_space<vmem>>, %arg3: memref<48x32xbf16, #tpu.memory_space<vmem>>, %arg4: memref<2x192x32xbf16, #tpu.memory_space<vmem>>, %arg5: memref<2x32x64xbf16, #tpu.memory_space<vmem>>, %arg6: memref<2x5x32xf32, #tpu.memory_space<vmem>>, %arg7: memref<2x1x64xf32, #tpu.memory_space<vmem>>, %arg8: memref<32x128xbf16, #tpu.memory_space<vmem>>, %arg9: memref<1x128xf32, #tpu.memory_space<vmem>>, %arg10: memref<24x128xf32, #tpu.memory_space<vmem>>) attributes {dimension_semantics = [#tpu.dimension_semantics<parallel>], iteration_bounds = array<i64: 2>, scalar_prefetch = 0 : i64, scratch_operands = 0 : i64, tpu.core_type = #tpu.core_type<tc>, window_params = [{transform_indices = @transform_0, window_bounds = array<i64: 24, 48>}, {pipeline_mode = #tpu.pipeline_mode<synchronous>, transform_indices = @transform_1, window_bounds = array<i64: 24, 32>}, {pipeline_mode = #tpu.pipeline_mode<synchronous>, transform_indices = @transform_2, window_bounds = array<i64: 48, 32>}, {pipeline_mode = #tpu.pipeline_mode<synchronous>, transform_indices = @transform_3, window_bounds = array<i64: 2, 192, 32>}, {pipeline_mode = #tpu.pipeline_mode<synchronous>, transform_indices = @transform_4, window_bounds = array<i64: 2, 32, 64>}, {pipeline_mode = #tpu.pipeline_mode<synchronous>, transform_indices = @transform_5, window_bounds = array<i64: 2, 5, 32>}, {pipeline_mode = #tpu.pipeline_mode<synchronous>, transform_indices = @transform_6, window_bounds = array<i64: 2, 1, 64>}, {pipeline_mode = #tpu.pipeline_mode<synchronous>, transform_indices = @transform_7, window_bounds = array<i64: 32, 128>}, {pipeline_mode = #tpu.pipeline_mode<synchronous>, transform_indices = @transform_8, window_bounds = array<i64: 1, 128>}, {transform_indices = @transform_9, window_bounds = array<i64: 24, 128>}]} {
    %c0 = arith.constant 0 : index
    %c0_0 = arith.constant 0 : index
    %0 = vector.load %arg1[%c0, %c0_0] : memref<24x48xf32, #tpu.memory_space<vmem>>, vector<24x48xf32>
    %c0_1 = arith.constant 0 : index
    %c0_2 = arith.constant 0 : index
    %1 = vector.load %arg3[%c0_1, %c0_2] : memref<48x32xbf16, #tpu.memory_space<vmem>>, vector<48x32xbf16>
    %2 = arith.truncf %0 : vector<24x48xf32> to vector<24x48xbf16>
    %cst = arith.constant dense<0.000000e+00> : vector<24x32xf32>
    %3 = tpu.matmul %2, %1, %cst {dimension_numbers = #tpu.dot_dimension_numbers<[1], [0], [0], [1], [0, 0, 1, 1], [], []>} : vector<24x48xbf16>, vector<48x32xbf16>, vector<24x32xf32> -> vector<24x32xf32>
    %c0_3 = arith.constant 0 : index
    %c0_4 = arith.constant 0 : index
    %4 = vector.load %arg2[%c0_3, %c0_4] : memref<24x32xf32, #tpu.memory_space<vmem>>, vector<24x32xf32>
    %5 = arith.addf %3, %4 : vector<24x32xf32>
    %6 = tpu.iota {dimensions = array<i32: 1>} : vector<24x24xi32>
    %c17_i32 = arith.constant 17 : i32
    %7 = vector.broadcast %c17_i32 : i32 to vector<24x24xi32>
    %8 = arith.cmpi slt, %6, %7 : vector<24x24xi32>
    %cst_5 = arith.constant 0.000000e+00 : f32
    %cst_6 = arith.constant -1.000000e+30 : f32
    %9 = vector.broadcast %cst_5 : f32 to vector<24x24xf32>
    %10 = vector.broadcast %cst_6 : f32 to vector<24x24xf32>
    %11 = arith.select %8, %9, %10 : vector<24x24xi1>, vector<24x24xf32>
    %12 = tpu.iota {dimensions = array<i32: 1>} : vector<1x32xi32>
    %c0_i32 = arith.constant 0 : i32
    %13 = vector.broadcast %c0_i32 : i32 to vector<1x32xi32>
    %14 = arith.cmpi sge, %12, %13 : vector<1x32xi32>
    %c16_i32 = arith.constant 16 : i32
    %15 = vector.broadcast %c16_i32 : i32 to vector<1x32xi32>
    %16 = arith.cmpi slt, %12, %15 : vector<1x32xi32>
    %17 = arith.andi %14, %16 : vector<1x32xi1>
    %18 = arith.extui %17 : vector<1x32xi1> to vector<1x32xi32>
    %19 = arith.sitofp %18 : vector<1x32xi32> to vector<1x32xf32>
    %c16_i32_7 = arith.constant 16 : i32
    %20 = vector.broadcast %c16_i32_7 : i32 to vector<1x32xi32>
    %21 = arith.cmpi sge, %12, %20 : vector<1x32xi32>
    %c32_i32 = arith.constant 32 : i32
    %22 = vector.broadcast %c32_i32 : i32 to vector<1x32xi32>
    %23 = arith.cmpi slt, %12, %22 : vector<1x32xi32>
    %24 = arith.andi %21, %23 : vector<1x32xi1>
    %25 = arith.extui %24 : vector<1x32xi1> to vector<1x32xi32>
    %26 = arith.sitofp %25 : vector<1x32xi32> to vector<1x32xf32>
    %cst_8 = arith.constant dense<0.000000e+00> : vector<24xf32>
    %27 = vector.multi_reduction <add>, %5, %cst_8 [1] : vector<24x32xf32> to vector<24xf32>
    %28 = vector.shape_cast %27 : vector<24xf32> to vector<24x1xf32>
    %cst_9 = arith.constant 3.200000e+01 : f32
    %29 = vector.broadcast %cst_9 : f32 to vector<24x1xf32>
    %30 = arith.divf %28, %29 : vector<24x1xf32>
    %31 = vector.broadcast %30 : vector<24x1xf32> to vector<24x32xf32>
    %32 = arith.subf %5, %31 : vector<24x32xf32>
    %33 = arith.mulf %32, %32 : vector<24x32xf32>
    %cst_10 = arith.constant dense<0.000000e+00> : vector<24xf32>
    %34 = vector.multi_reduction <add>, %33, %cst_10 [1] : vector<24x32xf32> to vector<24xf32>
    %35 = vector.shape_cast %34 : vector<24xf32> to vector<24x1xf32>
    %cst_11 = arith.constant 3.200000e+01 : f32
    %36 = vector.broadcast %cst_11 : f32 to vector<24x1xf32>
    %37 = arith.divf %35, %36 : vector<24x1xf32>
    %cst_12 = arith.constant 9.99999996E-13 : f32
    %38 = vector.broadcast %cst_12 : f32 to vector<24x1xf32>
    %39 = arith.addf %37, %38 : vector<24x1xf32>
    %40 = math.rsqrt %39 : vector<24x1xf32>
    %41 = vector.broadcast %40 : vector<24x1xf32> to vector<24x32xf32>
    %42 = arith.mulf %32, %41 : vector<24x32xf32>
    %c0_13 = arith.constant 0 : index
    %c0_14 = arith.constant 0 : index
    %c0_15 = arith.constant 0 : index
    %43 = vector.load %arg4[%c0_13, %c0_14, %c0_15] : memref<2x192x32xbf16, #tpu.memory_space<vmem>>, vector<1x32x32xbf16>
    %44 = vector.shape_cast %43 : vector<1x32x32xbf16> to vector<32x32xbf16>
    %45 = arith.truncf %42 : vector<24x32xf32> to vector<24x32xbf16>
    %cst_16 = arith.constant dense<0.000000e+00> : vector<24x32xf32>
    %46 = tpu.matmul %45, %44, %cst_16 {dimension_numbers = #tpu.dot_dimension_numbers<[1], [0], [0], [1], [0, 0, 1, 1], [], []>} : vector<24x32xbf16>, vector<32x32xbf16>, vector<24x32xf32> -> vector<24x32xf32>
    %c0_17 = arith.constant 0 : index
    %c0_18 = arith.constant 0 : index
    %c0_19 = arith.constant 0 : index
    %47 = vector.load %arg6[%c0_17, %c0_18, %c0_19] : memref<2x5x32xf32, #tpu.memory_space<vmem>>, vector<1x1x32xf32>
    %48 = vector.shape_cast %47 : vector<1x1x32xf32> to vector<1x32xf32>
    %49 = vector.broadcast %48 : vector<1x32xf32> to vector<24x32xf32>
    %50 = arith.addf %46, %49 : vector<24x32xf32>
    %c0_20 = arith.constant 0 : index
    %c32 = arith.constant 32 : index
    %c0_21 = arith.constant 0 : index
    %51 = vector.load %arg4[%c0_20, %c32, %c0_21] : memref<2x192x32xbf16, #tpu.memory_space<vmem>>, vector<1x32x32xbf16>
    %52 = vector.shape_cast %51 : vector<1x32x32xbf16> to vector<32x32xbf16>
    %53 = arith.truncf %42 : vector<24x32xf32> to vector<24x32xbf16>
    %cst_22 = arith.constant dense<0.000000e+00> : vector<24x32xf32>
    %54 = tpu.matmul %53, %52, %cst_22 {dimension_numbers = #tpu.dot_dimension_numbers<[1], [0], [0], [1], [0, 0, 1, 1], [], []>} : vector<24x32xbf16>, vector<32x32xbf16>, vector<24x32xf32> -> vector<24x32xf32>
    %c0_23 = arith.constant 0 : index
    %c1 = arith.constant 1 : index
    %c0_24 = arith.constant 0 : index
    %55 = vector.load %arg6[%c0_23, %c1, %c0_24] : memref<2x5x32xf32, #tpu.memory_space<vmem>>, vector<1x1x32xf32>
    %56 = vector.shape_cast %55 : vector<1x1x32xf32> to vector<1x32xf32>
    %57 = vector.broadcast %56 : vector<1x32xf32> to vector<24x32xf32>
    %58 = arith.addf %54, %57 : vector<24x32xf32>
    %c0_25 = arith.constant 0 : index
    %c64 = arith.constant 64 : index
    %c0_26 = arith.constant 0 : index
    %59 = vector.load %arg4[%c0_25, %c64, %c0_26] : memref<2x192x32xbf16, #tpu.memory_space<vmem>>, vector<1x32x32xbf16>
    %60 = vector.shape_cast %59 : vector<1x32x32xbf16> to vector<32x32xbf16>
    %61 = arith.truncf %42 : vector<24x32xf32> to vector<24x32xbf16>
    %cst_27 = arith.constant dense<0.000000e+00> : vector<24x32xf32>
    %62 = tpu.matmul %61, %60, %cst_27 {dimension_numbers = #tpu.dot_dimension_numbers<[1], [0], [0], [1], [0, 0, 1, 1], [], []>} : vector<24x32xbf16>, vector<32x32xbf16>, vector<24x32xf32> -> vector<24x32xf32>
    %c0_28 = arith.constant 0 : index
    %c2 = arith.constant 2 : index
    %c0_29 = arith.constant 0 : index
    %63 = vector.load %arg6[%c0_28, %c2, %c0_29] : memref<2x5x32xf32, #tpu.memory_space<vmem>>, vector<1x1x32xf32>
    %64 = vector.shape_cast %63 : vector<1x1x32xf32> to vector<1x32xf32>
    %65 = vector.broadcast %64 : vector<1x32xf32> to vector<24x32xf32>
    %66 = arith.addf %62, %65 : vector<24x32xf32>
    %67 = arith.truncf %58 : vector<24x32xf32> to vector<24x32xbf16>
    %cst_30 = arith.constant 0.000000e+00 : f32
    %68 = vector.broadcast %cst_30 : f32 to vector<24x32xf32>
    %69 = vector.broadcast %19 : vector<1x32xf32> to vector<24x32xf32>
    %70 = arith.mulf %50, %69 : vector<24x32xf32>
    %71 = arith.truncf %70 : vector<24x32xf32> to vector<24x32xbf16>
    %cst_31 = arith.constant dense<0.000000e+00> : vector<24x24xf32>
    %72 = tpu.matmul %71, %67, %cst_31 {dimension_numbers = #tpu.dot_dimension_numbers<[1], [1], [0], [0], [0, 0, 1, 0], [], []>} : vector<24x32xbf16>, vector<24x32xbf16>, vector<24x24xf32> -> vector<24x24xf32>
    %73 = arith.addf %72, %11 : vector<24x24xf32>
    %cst_32 = arith.constant dense<0xFF800000> : vector<24xf32>
    %74 = vector.multi_reduction <maximumf>, %73, %cst_32 [1] : vector<24x24xf32> to vector<24xf32>
    %75 = vector.shape_cast %74 : vector<24xf32> to vector<24x1xf32>
    %76 = vector.broadcast %75 : vector<24x1xf32> to vector<24x24xf32>
    %77 = arith.subf %73, %76 : vector<24x24xf32>
    %78 = math.exp %77 : vector<24x24xf32>
    %cst_33 = arith.constant dense<0.000000e+00> : vector<24xf32>
    %79 = vector.multi_reduction <add>, %78, %cst_33 [1] : vector<24x24xf32> to vector<24xf32>
    %80 = vector.shape_cast %79 : vector<24xf32> to vector<24x1xf32>
    %81 = vector.broadcast %80 : vector<24x1xf32> to vector<24x24xf32>
    %82 = arith.divf %78, %81 : vector<24x24xf32>
    %83 = vector.broadcast %19 : vector<1x32xf32> to vector<24x32xf32>
    %84 = arith.mulf %66, %83 : vector<24x32xf32>
    %85 = arith.truncf %82 : vector<24x24xf32> to vector<24x24xbf16>
    %86 = arith.truncf %84 : vector<24x32xf32> to vector<24x32xbf16>
    %cst_34 = arith.constant dense<0.000000e+00> : vector<24x32xf32>
    %87 = tpu.matmul %85, %86, %cst_34 {dimension_numbers = #tpu.dot_dimension_numbers<[1], [0], [0], [1], [0, 0, 1, 1], [], []>} : vector<24x24xbf16>, vector<24x32xbf16>, vector<24x32xf32> -> vector<24x32xf32>
    %88 = arith.addf %68, %87 : vector<24x32xf32>
    %89 = vector.broadcast %26 : vector<1x32xf32> to vector<24x32xf32>
    %90 = arith.mulf %50, %89 : vector<24x32xf32>
    %91 = arith.truncf %90 : vector<24x32xf32> to vector<24x32xbf16>
    %cst_35 = arith.constant dense<0.000000e+00> : vector<24x24xf32>
    %92 = tpu.matmul %91, %67, %cst_35 {dimension_numbers = #tpu.dot_dimension_numbers<[1], [1], [0], [0], [0, 0, 1, 0], [], []>} : vector<24x32xbf16>, vector<24x32xbf16>, vector<24x24xf32> -> vector<24x24xf32>
    %93 = arith.addf %92, %11 : vector<24x24xf32>
    %cst_36 = arith.constant dense<0xFF800000> : vector<24xf32>
    %94 = vector.multi_reduction <maximumf>, %93, %cst_36 [1] : vector<24x24xf32> to vector<24xf32>
    %95 = vector.shape_cast %94 : vector<24xf32> to vector<24x1xf32>
    %96 = vector.broadcast %95 : vector<24x1xf32> to vector<24x24xf32>
    %97 = arith.subf %93, %96 : vector<24x24xf32>
    %98 = math.exp %97 : vector<24x24xf32>
    %cst_37 = arith.constant dense<0.000000e+00> : vector<24xf32>
    %99 = vector.multi_reduction <add>, %98, %cst_37 [1] : vector<24x24xf32> to vector<24xf32>
    %100 = vector.shape_cast %99 : vector<24xf32> to vector<24x1xf32>
    %101 = vector.broadcast %100 : vector<24x1xf32> to vector<24x24xf32>
    %102 = arith.divf %98, %101 : vector<24x24xf32>
    %103 = vector.broadcast %26 : vector<1x32xf32> to vector<24x32xf32>
    %104 = arith.mulf %66, %103 : vector<24x32xf32>
    %105 = arith.truncf %102 : vector<24x24xf32> to vector<24x24xbf16>
    %106 = arith.truncf %104 : vector<24x32xf32> to vector<24x32xbf16>
    %cst_38 = arith.constant dense<0.000000e+00> : vector<24x32xf32>
    %107 = tpu.matmul %105, %106, %cst_38 {dimension_numbers = #tpu.dot_dimension_numbers<[1], [0], [0], [1], [0, 0, 1, 1], [], []>} : vector<24x24xbf16>, vector<24x32xbf16>, vector<24x32xf32> -> vector<24x32xf32>
    %108 = arith.addf %88, %107 : vector<24x32xf32>
    %c0_39 = arith.constant 0 : index
    %c96 = arith.constant 96 : index
    %c0_40 = arith.constant 0 : index
    %109 = vector.load %arg4[%c0_39, %c96, %c0_40] : memref<2x192x32xbf16, #tpu.memory_space<vmem>>, vector<1x32x32xbf16>
    %110 = vector.shape_cast %109 : vector<1x32x32xbf16> to vector<32x32xbf16>
    %111 = arith.truncf %108 : vector<24x32xf32> to vector<24x32xbf16>
    %cst_41 = arith.constant dense<0.000000e+00> : vector<24x32xf32>
    %112 = tpu.matmul %111, %110, %cst_41 {dimension_numbers = #tpu.dot_dimension_numbers<[1], [0], [0], [1], [0, 0, 1, 1], [], []>} : vector<24x32xbf16>, vector<32x32xbf16>, vector<24x32xf32> -> vector<24x32xf32>
    %113 = arith.addf %5, %112 : vector<24x32xf32>
    %c0_42 = arith.constant 0 : index
    %c3 = arith.constant 3 : index
    %c0_43 = arith.constant 0 : index
    %114 = vector.load %arg6[%c0_42, %c3, %c0_43] : memref<2x5x32xf32, #tpu.memory_space<vmem>>, vector<1x1x32xf32>
    %115 = vector.shape_cast %114 : vector<1x1x32xf32> to vector<1x32xf32>
    %116 = vector.broadcast %115 : vector<1x32xf32> to vector<24x32xf32>
    %117 = arith.addf %113, %116 : vector<24x32xf32>
    %cst_44 = arith.constant dense<0.000000e+00> : vector<24xf32>
    %118 = vector.multi_reduction <add>, %117, %cst_44 [1] : vector<24x32xf32> to vector<24xf32>
    %119 = vector.shape_cast %118 : vector<24xf32> to vector<24x1xf32>
    %cst_45 = arith.constant 3.200000e+01 : f32
    %120 = vector.broadcast %cst_45 : f32 to vector<24x1xf32>
    %121 = arith.divf %119, %120 : vector<24x1xf32>
    %122 = vector.broadcast %121 : vector<24x1xf32> to vector<24x32xf32>
    %123 = arith.subf %117, %122 : vector<24x32xf32>
    %124 = arith.mulf %123, %123 : vector<24x32xf32>
    %cst_46 = arith.constant dense<0.000000e+00> : vector<24xf32>
    %125 = vector.multi_reduction <add>, %124, %cst_46 [1] : vector<24x32xf32> to vector<24xf32>
    %126 = vector.shape_cast %125 : vector<24xf32> to vector<24x1xf32>
    %cst_47 = arith.constant 3.200000e+01 : f32
    %127 = vector.broadcast %cst_47 : f32 to vector<24x1xf32>
    %128 = arith.divf %126, %127 : vector<24x1xf32>
    %cst_48 = arith.constant 9.99999996E-13 : f32
    %129 = vector.broadcast %cst_48 : f32 to vector<24x1xf32>
    %130 = arith.addf %128, %129 : vector<24x1xf32>
    %131 = math.rsqrt %130 : vector<24x1xf32>
    %132 = vector.broadcast %131 : vector<24x1xf32> to vector<24x32xf32>
    %133 = arith.mulf %123, %132 : vector<24x32xf32>
    %c0_49 = arith.constant 0 : index
    %c0_50 = arith.constant 0 : index
    %c0_51 = arith.constant 0 : index
    %134 = vector.load %arg5[%c0_49, %c0_50, %c0_51] : memref<2x32x64xbf16, #tpu.memory_space<vmem>>, vector<1x32x64xbf16>
    %135 = vector.shape_cast %134 : vector<1x32x64xbf16> to vector<32x64xbf16>
    %136 = arith.truncf %133 : vector<24x32xf32> to vector<24x32xbf16>
    %cst_52 = arith.constant dense<0.000000e+00> : vector<24x64xf32>
    %137 = tpu.matmul %136, %135, %cst_52 {dimension_numbers = #tpu.dot_dimension_numbers<[1], [0], [0], [1], [0, 0, 1, 1], [], []>} : vector<24x32xbf16>, vector<32x64xbf16>, vector<24x64xf32> -> vector<24x64xf32>
    %c0_53 = arith.constant 0 : index
    %c0_54 = arith.constant 0 : index
    %c0_55 = arith.constant 0 : index
    %138 = vector.load %arg7[%c0_53, %c0_54, %c0_55] : memref<2x1x64xf32, #tpu.memory_space<vmem>>, vector<1x1x64xf32>
    %139 = vector.shape_cast %138 : vector<1x1x64xf32> to vector<1x64xf32>
    %140 = vector.broadcast %139 : vector<1x64xf32> to vector<24x64xf32>
    %141 = arith.addf %137, %140 : vector<24x64xf32>
    %cst_56 = arith.constant 5.000000e-01 : f32
    %142 = vector.broadcast %cst_56 : f32 to vector<24x64xf32>
    %143 = arith.mulf %142, %141 : vector<24x64xf32>
    %cst_57 = arith.constant 0.707106769 : f32
    %144 = vector.broadcast %cst_57 : f32 to vector<24x64xf32>
    %145 = arith.mulf %141, %144 : vector<24x64xf32>
    %cst_58 = arith.constant 0.000000e+00 : f32
    %146 = vector.broadcast %cst_58 : f32 to vector<24x64xf32>
    %147 = arith.cmpf oge, %145, %146 : vector<24x64xf32>
    %cst_59 = arith.constant 1.000000e+00 : f32
    %cst_60 = arith.constant -1.000000e+00 : f32
    %148 = vector.broadcast %cst_59 : f32 to vector<24x64xf32>
    %149 = vector.broadcast %cst_60 : f32 to vector<24x64xf32>
    %150 = arith.select %147, %148, %149 : vector<24x64xi1>, vector<24x64xf32>
    %151 = math.absf %145 : vector<24x64xf32>
    %cst_61 = arith.constant 0.327591091 : f32
    %152 = vector.broadcast %cst_61 : f32 to vector<24x64xf32>
    %153 = arith.mulf %152, %151 : vector<24x64xf32>
    %cst_62 = arith.constant 1.000000e+00 : f32
    %154 = vector.broadcast %cst_62 : f32 to vector<24x64xf32>
    %155 = arith.addf %154, %153 : vector<24x64xf32>
    %cst_63 = arith.constant 1.000000e+00 : f32
    %156 = vector.broadcast %cst_63 : f32 to vector<24x64xf32>
    %157 = arith.divf %156, %155 : vector<24x64xf32>
    %cst_64 = arith.constant 1.06140542 : f32
    %158 = vector.broadcast %cst_64 : f32 to vector<24x64xf32>
    %159 = arith.mulf %158, %157 : vector<24x64xf32>
    %cst_65 = arith.constant -1.45315206 : f32
    %160 = vector.broadcast %cst_65 : f32 to vector<24x64xf32>
    %161 = arith.addf %159, %160 : vector<24x64xf32>
    %162 = arith.mulf %161, %157 : vector<24x64xf32>
    %cst_66 = arith.constant 1.42141378 : f32
    %163 = vector.broadcast %cst_66 : f32 to vector<24x64xf32>
    %164 = arith.addf %162, %163 : vector<24x64xf32>
    %165 = arith.mulf %164, %157 : vector<24x64xf32>
    %cst_67 = arith.constant -0.284496725 : f32
    %166 = vector.broadcast %cst_67 : f32 to vector<24x64xf32>
    %167 = arith.addf %165, %166 : vector<24x64xf32>
    %168 = arith.mulf %167, %157 : vector<24x64xf32>
    %cst_68 = arith.constant 0.254829586 : f32
    %169 = vector.broadcast %cst_68 : f32 to vector<24x64xf32>
    %170 = arith.addf %168, %169 : vector<24x64xf32>
    %171 = arith.mulf %170, %157 : vector<24x64xf32>
    %cst_69 = arith.constant 0.000000e+00 : f32
    %172 = vector.broadcast %cst_69 : f32 to vector<24x64xf32>
    %173 = arith.subf %172, %151 : vector<24x64xf32>
    %174 = arith.mulf %173, %151 : vector<24x64xf32>
    %175 = math.exp %174 : vector<24x64xf32>
    %176 = arith.mulf %171, %175 : vector<24x64xf32>
    %cst_70 = arith.constant 1.000000e+00 : f32
    %177 = vector.broadcast %cst_70 : f32 to vector<24x64xf32>
    %178 = arith.subf %177, %176 : vector<24x64xf32>
    %179 = arith.mulf %150, %178 : vector<24x64xf32>
    %cst_71 = arith.constant 1.000000e+00 : f32
    %180 = vector.broadcast %cst_71 : f32 to vector<24x64xf32>
    %181 = arith.addf %180, %179 : vector<24x64xf32>
    %182 = arith.mulf %143, %181 : vector<24x64xf32>
    %c0_72 = arith.constant 0 : index
    %c128 = arith.constant 128 : index
    %c0_73 = arith.constant 0 : index
    %183 = vector.load %arg4[%c0_72, %c128, %c0_73] : memref<2x192x32xbf16, #tpu.memory_space<vmem>>, vector<1x64x32xbf16>
    %184 = vector.shape_cast %183 : vector<1x64x32xbf16> to vector<64x32xbf16>
    %185 = arith.truncf %182 : vector<24x64xf32> to vector<24x64xbf16>
    %cst_74 = arith.constant dense<0.000000e+00> : vector<24x32xf32>
    %186 = tpu.matmul %185, %184, %cst_74 {dimension_numbers = #tpu.dot_dimension_numbers<[1], [0], [0], [1], [0, 0, 1, 1], [], []>} : vector<24x64xbf16>, vector<64x32xbf16>, vector<24x32xf32> -> vector<24x32xf32>
    %187 = arith.addf %117, %186 : vector<24x32xf32>
    %c0_75 = arith.constant 0 : index
    %c4 = arith.constant 4 : index
    %c0_76 = arith.constant 0 : index
    %188 = vector.load %arg6[%c0_75, %c4, %c0_76] : memref<2x5x32xf32, #tpu.memory_space<vmem>>, vector<1x1x32xf32>
    %189 = vector.shape_cast %188 : vector<1x1x32xf32> to vector<1x32xf32>
    %190 = vector.broadcast %189 : vector<1x32xf32> to vector<24x32xf32>
    %191 = arith.addf %187, %190 : vector<24x32xf32>
    %cst_77 = arith.constant dense<0.000000e+00> : vector<24xf32>
    %192 = vector.multi_reduction <add>, %191, %cst_77 [1] : vector<24x32xf32> to vector<24xf32>
    %193 = vector.shape_cast %192 : vector<24xf32> to vector<24x1xf32>
    %cst_78 = arith.constant 3.200000e+01 : f32
    %194 = vector.broadcast %cst_78 : f32 to vector<24x1xf32>
    %195 = arith.divf %193, %194 : vector<24x1xf32>
    %196 = vector.broadcast %195 : vector<24x1xf32> to vector<24x32xf32>
    %197 = arith.subf %191, %196 : vector<24x32xf32>
    %198 = arith.mulf %197, %197 : vector<24x32xf32>
    %cst_79 = arith.constant dense<0.000000e+00> : vector<24xf32>
    %199 = vector.multi_reduction <add>, %198, %cst_79 [1] : vector<24x32xf32> to vector<24xf32>
    %200 = vector.shape_cast %199 : vector<24xf32> to vector<24x1xf32>
    %cst_80 = arith.constant 3.200000e+01 : f32
    %201 = vector.broadcast %cst_80 : f32 to vector<24x1xf32>
    %202 = arith.divf %200, %201 : vector<24x1xf32>
    %cst_81 = arith.constant 9.99999996E-13 : f32
    %203 = vector.broadcast %cst_81 : f32 to vector<24x1xf32>
    %204 = arith.addf %202, %203 : vector<24x1xf32>
    %205 = math.rsqrt %204 : vector<24x1xf32>
    %206 = vector.broadcast %205 : vector<24x1xf32> to vector<24x32xf32>
    %207 = arith.mulf %197, %206 : vector<24x32xf32>
    %c1_82 = arith.constant 1 : index
    %c0_83 = arith.constant 0 : index
    %c0_84 = arith.constant 0 : index
    %208 = vector.load %arg4[%c1_82, %c0_83, %c0_84] : memref<2x192x32xbf16, #tpu.memory_space<vmem>>, vector<1x32x32xbf16>
    %209 = vector.shape_cast %208 : vector<1x32x32xbf16> to vector<32x32xbf16>
    %210 = arith.truncf %207 : vector<24x32xf32> to vector<24x32xbf16>
    %cst_85 = arith.constant dense<0.000000e+00> : vector<24x32xf32>
    %211 = tpu.matmul %210, %209, %cst_85 {dimension_numbers = #tpu.dot_dimension_numbers<[1], [0], [0], [1], [0, 0, 1, 1], [], []>} : vector<24x32xbf16>, vector<32x32xbf16>, vector<24x32xf32> -> vector<24x32xf32>
    %c1_86 = arith.constant 1 : index
    %c0_87 = arith.constant 0 : index
    %c0_88 = arith.constant 0 : index
    %212 = vector.load %arg6[%c1_86, %c0_87, %c0_88] : memref<2x5x32xf32, #tpu.memory_space<vmem>>, vector<1x1x32xf32>
    %213 = vector.shape_cast %212 : vector<1x1x32xf32> to vector<1x32xf32>
    %214 = vector.broadcast %213 : vector<1x32xf32> to vector<24x32xf32>
    %215 = arith.addf %211, %214 : vector<24x32xf32>
    %c1_89 = arith.constant 1 : index
    %c32_90 = arith.constant 32 : index
    %c0_91 = arith.constant 0 : index
    %216 = vector.load %arg4[%c1_89, %c32_90, %c0_91] : memref<2x192x32xbf16, #tpu.memory_space<vmem>>, vector<1x32x32xbf16>
    %217 = vector.shape_cast %216 : vector<1x32x32xbf16> to vector<32x32xbf16>
    %218 = arith.truncf %207 : vector<24x32xf32> to vector<24x32xbf16>
    %cst_92 = arith.constant dense<0.000000e+00> : vector<24x32xf32>
    %219 = tpu.matmul %218, %217, %cst_92 {dimension_numbers = #tpu.dot_dimension_numbers<[1], [0], [0], [1], [0, 0, 1, 1], [], []>} : vector<24x32xbf16>, vector<32x32xbf16>, vector<24x32xf32> -> vector<24x32xf32>
    %c1_93 = arith.constant 1 : index
    %c1_94 = arith.constant 1 : index
    %c0_95 = arith.constant 0 : index
    %220 = vector.load %arg6[%c1_93, %c1_94, %c0_95] : memref<2x5x32xf32, #tpu.memory_space<vmem>>, vector<1x1x32xf32>
    %221 = vector.shape_cast %220 : vector<1x1x32xf32> to vector<1x32xf32>
    %222 = vector.broadcast %221 : vector<1x32xf32> to vector<24x32xf32>
    %223 = arith.addf %219, %222 : vector<24x32xf32>
    %c1_96 = arith.constant 1 : index
    %c64_97 = arith.constant 64 : index
    %c0_98 = arith.constant 0 : index
    %224 = vector.load %arg4[%c1_96, %c64_97, %c0_98] : memref<2x192x32xbf16, #tpu.memory_space<vmem>>, vector<1x32x32xbf16>
    %225 = vector.shape_cast %224 : vector<1x32x32xbf16> to vector<32x32xbf16>
    %226 = arith.truncf %207 : vector<24x32xf32> to vector<24x32xbf16>
    %cst_99 = arith.constant dense<0.000000e+00> : vector<24x32xf32>
    %227 = tpu.matmul %226, %225, %cst_99 {dimension_numbers = #tpu.dot_dimension_numbers<[1], [0], [0], [1], [0, 0, 1, 1], [], []>} : vector<24x32xbf16>, vector<32x32xbf16>, vector<24x32xf32> -> vector<24x32xf32>
    %c1_100 = arith.constant 1 : index
    %c2_101 = arith.constant 2 : index
    %c0_102 = arith.constant 0 : index
    %228 = vector.load %arg6[%c1_100, %c2_101, %c0_102] : memref<2x5x32xf32, #tpu.memory_space<vmem>>, vector<1x1x32xf32>
    %229 = vector.shape_cast %228 : vector<1x1x32xf32> to vector<1x32xf32>
    %230 = vector.broadcast %229 : vector<1x32xf32> to vector<24x32xf32>
    %231 = arith.addf %227, %230 : vector<24x32xf32>
    %232 = arith.truncf %223 : vector<24x32xf32> to vector<24x32xbf16>
    %cst_103 = arith.constant 0.000000e+00 : f32
    %233 = vector.broadcast %cst_103 : f32 to vector<24x32xf32>
    %234 = vector.broadcast %19 : vector<1x32xf32> to vector<24x32xf32>
    %235 = arith.mulf %215, %234 : vector<24x32xf32>
    %236 = arith.truncf %235 : vector<24x32xf32> to vector<24x32xbf16>
    %cst_104 = arith.constant dense<0.000000e+00> : vector<24x24xf32>
    %237 = tpu.matmul %236, %232, %cst_104 {dimension_numbers = #tpu.dot_dimension_numbers<[1], [1], [0], [0], [0, 0, 1, 0], [], []>} : vector<24x32xbf16>, vector<24x32xbf16>, vector<24x24xf32> -> vector<24x24xf32>
    %238 = arith.addf %237, %11 : vector<24x24xf32>
    %cst_105 = arith.constant dense<0xFF800000> : vector<24xf32>
    %239 = vector.multi_reduction <maximumf>, %238, %cst_105 [1] : vector<24x24xf32> to vector<24xf32>
    %240 = vector.shape_cast %239 : vector<24xf32> to vector<24x1xf32>
    %241 = vector.broadcast %240 : vector<24x1xf32> to vector<24x24xf32>
    %242 = arith.subf %238, %241 : vector<24x24xf32>
    %243 = math.exp %242 : vector<24x24xf32>
    %cst_106 = arith.constant dense<0.000000e+00> : vector<24xf32>
    %244 = vector.multi_reduction <add>, %243, %cst_106 [1] : vector<24x24xf32> to vector<24xf32>
    %245 = vector.shape_cast %244 : vector<24xf32> to vector<24x1xf32>
    %246 = vector.broadcast %245 : vector<24x1xf32> to vector<24x24xf32>
    %247 = arith.divf %243, %246 : vector<24x24xf32>
    %248 = vector.broadcast %19 : vector<1x32xf32> to vector<24x32xf32>
    %249 = arith.mulf %231, %248 : vector<24x32xf32>
    %250 = arith.truncf %247 : vector<24x24xf32> to vector<24x24xbf16>
    %251 = arith.truncf %249 : vector<24x32xf32> to vector<24x32xbf16>
    %cst_107 = arith.constant dense<0.000000e+00> : vector<24x32xf32>
    %252 = tpu.matmul %250, %251, %cst_107 {dimension_numbers = #tpu.dot_dimension_numbers<[1], [0], [0], [1], [0, 0, 1, 1], [], []>} : vector<24x24xbf16>, vector<24x32xbf16>, vector<24x32xf32> -> vector<24x32xf32>
    %253 = arith.addf %233, %252 : vector<24x32xf32>
    %254 = vector.broadcast %26 : vector<1x32xf32> to vector<24x32xf32>
    %255 = arith.mulf %215, %254 : vector<24x32xf32>
    %256 = arith.truncf %255 : vector<24x32xf32> to vector<24x32xbf16>
    %cst_108 = arith.constant dense<0.000000e+00> : vector<24x24xf32>
    %257 = tpu.matmul %256, %232, %cst_108 {dimension_numbers = #tpu.dot_dimension_numbers<[1], [1], [0], [0], [0, 0, 1, 0], [], []>} : vector<24x32xbf16>, vector<24x32xbf16>, vector<24x24xf32> -> vector<24x24xf32>
    %258 = arith.addf %257, %11 : vector<24x24xf32>
    %cst_109 = arith.constant dense<0xFF800000> : vector<24xf32>
    %259 = vector.multi_reduction <maximumf>, %258, %cst_109 [1] : vector<24x24xf32> to vector<24xf32>
    %260 = vector.shape_cast %259 : vector<24xf32> to vector<24x1xf32>
    %261 = vector.broadcast %260 : vector<24x1xf32> to vector<24x24xf32>
    %262 = arith.subf %258, %261 : vector<24x24xf32>
    %263 = math.exp %262 : vector<24x24xf32>
    %cst_110 = arith.constant dense<0.000000e+00> : vector<24xf32>
    %264 = vector.multi_reduction <add>, %263, %cst_110 [1] : vector<24x24xf32> to vector<24xf32>
    %265 = vector.shape_cast %264 : vector<24xf32> to vector<24x1xf32>
    %266 = vector.broadcast %265 : vector<24x1xf32> to vector<24x24xf32>
    %267 = arith.divf %263, %266 : vector<24x24xf32>
    %268 = vector.broadcast %26 : vector<1x32xf32> to vector<24x32xf32>
    %269 = arith.mulf %231, %268 : vector<24x32xf32>
    %270 = arith.truncf %267 : vector<24x24xf32> to vector<24x24xbf16>
    %271 = arith.truncf %269 : vector<24x32xf32> to vector<24x32xbf16>
    %cst_111 = arith.constant dense<0.000000e+00> : vector<24x32xf32>
    %272 = tpu.matmul %270, %271, %cst_111 {dimension_numbers = #tpu.dot_dimension_numbers<[1], [0], [0], [1], [0, 0, 1, 1], [], []>} : vector<24x24xbf16>, vector<24x32xbf16>, vector<24x32xf32> -> vector<24x32xf32>
    %273 = arith.addf %253, %272 : vector<24x32xf32>
    %c1_112 = arith.constant 1 : index
    %c96_113 = arith.constant 96 : index
    %c0_114 = arith.constant 0 : index
    %274 = vector.load %arg4[%c1_112, %c96_113, %c0_114] : memref<2x192x32xbf16, #tpu.memory_space<vmem>>, vector<1x32x32xbf16>
    %275 = vector.shape_cast %274 : vector<1x32x32xbf16> to vector<32x32xbf16>
    %276 = arith.truncf %273 : vector<24x32xf32> to vector<24x32xbf16>
    %cst_115 = arith.constant dense<0.000000e+00> : vector<24x32xf32>
    %277 = tpu.matmul %276, %275, %cst_115 {dimension_numbers = #tpu.dot_dimension_numbers<[1], [0], [0], [1], [0, 0, 1, 1], [], []>} : vector<24x32xbf16>, vector<32x32xbf16>, vector<24x32xf32> -> vector<24x32xf32>
    %278 = arith.addf %191, %277 : vector<24x32xf32>
    %c1_116 = arith.constant 1 : index
    %c3_117 = arith.constant 3 : index
    %c0_118 = arith.constant 0 : index
    %279 = vector.load %arg6[%c1_116, %c3_117, %c0_118] : memref<2x5x32xf32, #tpu.memory_space<vmem>>, vector<1x1x32xf32>
    %280 = vector.shape_cast %279 : vector<1x1x32xf32> to vector<1x32xf32>
    %281 = vector.broadcast %280 : vector<1x32xf32> to vector<24x32xf32>
    %282 = arith.addf %278, %281 : vector<24x32xf32>
    %cst_119 = arith.constant dense<0.000000e+00> : vector<24xf32>
    %283 = vector.multi_reduction <add>, %282, %cst_119 [1] : vector<24x32xf32> to vector<24xf32>
    %284 = vector.shape_cast %283 : vector<24xf32> to vector<24x1xf32>
    %cst_120 = arith.constant 3.200000e+01 : f32
    %285 = vector.broadcast %cst_120 : f32 to vector<24x1xf32>
    %286 = arith.divf %284, %285 : vector<24x1xf32>
    %287 = vector.broadcast %286 : vector<24x1xf32> to vector<24x32xf32>
    %288 = arith.subf %282, %287 : vector<24x32xf32>
    %289 = arith.mulf %288, %288 : vector<24x32xf32>
    %cst_121 = arith.constant dense<0.000000e+00> : vector<24xf32>
    %290 = vector.multi_reduction <add>, %289, %cst_121 [1] : vector<24x32xf32> to vector<24xf32>
    %291 = vector.shape_cast %290 : vector<24xf32> to vector<24x1xf32>
    %cst_122 = arith.constant 3.200000e+01 : f32
    %292 = vector.broadcast %cst_122 : f32 to vector<24x1xf32>
    %293 = arith.divf %291, %292 : vector<24x1xf32>
    %cst_123 = arith.constant 9.99999996E-13 : f32
    %294 = vector.broadcast %cst_123 : f32 to vector<24x1xf32>
    %295 = arith.addf %293, %294 : vector<24x1xf32>
    %296 = math.rsqrt %295 : vector<24x1xf32>
    %297 = vector.broadcast %296 : vector<24x1xf32> to vector<24x32xf32>
    %298 = arith.mulf %288, %297 : vector<24x32xf32>
    %c1_124 = arith.constant 1 : index
    %c0_125 = arith.constant 0 : index
    %c0_126 = arith.constant 0 : index
    %299 = vector.load %arg5[%c1_124, %c0_125, %c0_126] : memref<2x32x64xbf16, #tpu.memory_space<vmem>>, vector<1x32x64xbf16>
    %300 = vector.shape_cast %299 : vector<1x32x64xbf16> to vector<32x64xbf16>
    %301 = arith.truncf %298 : vector<24x32xf32> to vector<24x32xbf16>
    %cst_127 = arith.constant dense<0.000000e+00> : vector<24x64xf32>
    %302 = tpu.matmul %301, %300, %cst_127 {dimension_numbers = #tpu.dot_dimension_numbers<[1], [0], [0], [1], [0, 0, 1, 1], [], []>} : vector<24x32xbf16>, vector<32x64xbf16>, vector<24x64xf32> -> vector<24x64xf32>
    %c1_128 = arith.constant 1 : index
    %c0_129 = arith.constant 0 : index
    %c0_130 = arith.constant 0 : index
    %303 = vector.load %arg7[%c1_128, %c0_129, %c0_130] : memref<2x1x64xf32, #tpu.memory_space<vmem>>, vector<1x1x64xf32>
    %304 = vector.shape_cast %303 : vector<1x1x64xf32> to vector<1x64xf32>
    %305 = vector.broadcast %304 : vector<1x64xf32> to vector<24x64xf32>
    %306 = arith.addf %302, %305 : vector<24x64xf32>
    %cst_131 = arith.constant 5.000000e-01 : f32
    %307 = vector.broadcast %cst_131 : f32 to vector<24x64xf32>
    %308 = arith.mulf %307, %306 : vector<24x64xf32>
    %cst_132 = arith.constant 0.707106769 : f32
    %309 = vector.broadcast %cst_132 : f32 to vector<24x64xf32>
    %310 = arith.mulf %306, %309 : vector<24x64xf32>
    %cst_133 = arith.constant 0.000000e+00 : f32
    %311 = vector.broadcast %cst_133 : f32 to vector<24x64xf32>
    %312 = arith.cmpf oge, %310, %311 : vector<24x64xf32>
    %cst_134 = arith.constant 1.000000e+00 : f32
    %cst_135 = arith.constant -1.000000e+00 : f32
    %313 = vector.broadcast %cst_134 : f32 to vector<24x64xf32>
    %314 = vector.broadcast %cst_135 : f32 to vector<24x64xf32>
    %315 = arith.select %312, %313, %314 : vector<24x64xi1>, vector<24x64xf32>
    %316 = math.absf %310 : vector<24x64xf32>
    %cst_136 = arith.constant 0.327591091 : f32
    %317 = vector.broadcast %cst_136 : f32 to vector<24x64xf32>
    %318 = arith.mulf %317, %316 : vector<24x64xf32>
    %cst_137 = arith.constant 1.000000e+00 : f32
    %319 = vector.broadcast %cst_137 : f32 to vector<24x64xf32>
    %320 = arith.addf %319, %318 : vector<24x64xf32>
    %cst_138 = arith.constant 1.000000e+00 : f32
    %321 = vector.broadcast %cst_138 : f32 to vector<24x64xf32>
    %322 = arith.divf %321, %320 : vector<24x64xf32>
    %cst_139 = arith.constant 1.06140542 : f32
    %323 = vector.broadcast %cst_139 : f32 to vector<24x64xf32>
    %324 = arith.mulf %323, %322 : vector<24x64xf32>
    %cst_140 = arith.constant -1.45315206 : f32
    %325 = vector.broadcast %cst_140 : f32 to vector<24x64xf32>
    %326 = arith.addf %324, %325 : vector<24x64xf32>
    %327 = arith.mulf %326, %322 : vector<24x64xf32>
    %cst_141 = arith.constant 1.42141378 : f32
    %328 = vector.broadcast %cst_141 : f32 to vector<24x64xf32>
    %329 = arith.addf %327, %328 : vector<24x64xf32>
    %330 = arith.mulf %329, %322 : vector<24x64xf32>
    %cst_142 = arith.constant -0.284496725 : f32
    %331 = vector.broadcast %cst_142 : f32 to vector<24x64xf32>
    %332 = arith.addf %330, %331 : vector<24x64xf32>
    %333 = arith.mulf %332, %322 : vector<24x64xf32>
    %cst_143 = arith.constant 0.254829586 : f32
    %334 = vector.broadcast %cst_143 : f32 to vector<24x64xf32>
    %335 = arith.addf %333, %334 : vector<24x64xf32>
    %336 = arith.mulf %335, %322 : vector<24x64xf32>
    %cst_144 = arith.constant 0.000000e+00 : f32
    %337 = vector.broadcast %cst_144 : f32 to vector<24x64xf32>
    %338 = arith.subf %337, %316 : vector<24x64xf32>
    %339 = arith.mulf %338, %316 : vector<24x64xf32>
    %340 = math.exp %339 : vector<24x64xf32>
    %341 = arith.mulf %336, %340 : vector<24x64xf32>
    %cst_145 = arith.constant 1.000000e+00 : f32
    %342 = vector.broadcast %cst_145 : f32 to vector<24x64xf32>
    %343 = arith.subf %342, %341 : vector<24x64xf32>
    %344 = arith.mulf %315, %343 : vector<24x64xf32>
    %cst_146 = arith.constant 1.000000e+00 : f32
    %345 = vector.broadcast %cst_146 : f32 to vector<24x64xf32>
    %346 = arith.addf %345, %344 : vector<24x64xf32>
    %347 = arith.mulf %308, %346 : vector<24x64xf32>
    %c1_147 = arith.constant 1 : index
    %c128_148 = arith.constant 128 : index
    %c0_149 = arith.constant 0 : index
    %348 = vector.load %arg4[%c1_147, %c128_148, %c0_149] : memref<2x192x32xbf16, #tpu.memory_space<vmem>>, vector<1x64x32xbf16>
    %349 = vector.shape_cast %348 : vector<1x64x32xbf16> to vector<64x32xbf16>
    %350 = arith.truncf %347 : vector<24x64xf32> to vector<24x64xbf16>
    %cst_150 = arith.constant dense<0.000000e+00> : vector<24x32xf32>
    %351 = tpu.matmul %350, %349, %cst_150 {dimension_numbers = #tpu.dot_dimension_numbers<[1], [0], [0], [1], [0, 0, 1, 1], [], []>} : vector<24x64xbf16>, vector<64x32xbf16>, vector<24x32xf32> -> vector<24x32xf32>
    %352 = arith.addf %282, %351 : vector<24x32xf32>
    %c1_151 = arith.constant 1 : index
    %c4_152 = arith.constant 4 : index
    %c0_153 = arith.constant 0 : index
    %353 = vector.load %arg6[%c1_151, %c4_152, %c0_153] : memref<2x5x32xf32, #tpu.memory_space<vmem>>, vector<1x1x32xf32>
    %354 = vector.shape_cast %353 : vector<1x1x32xf32> to vector<1x32xf32>
    %355 = vector.broadcast %354 : vector<1x32xf32> to vector<24x32xf32>
    %356 = arith.addf %352, %355 : vector<24x32xf32>
    %cst_154 = arith.constant dense<0.000000e+00> : vector<24xf32>
    %357 = vector.multi_reduction <add>, %356, %cst_154 [1] : vector<24x32xf32> to vector<24xf32>
    %358 = vector.shape_cast %357 : vector<24xf32> to vector<24x1xf32>
    %cst_155 = arith.constant 3.200000e+01 : f32
    %359 = vector.broadcast %cst_155 : f32 to vector<24x1xf32>
    %360 = arith.divf %358, %359 : vector<24x1xf32>
    %361 = vector.broadcast %360 : vector<24x1xf32> to vector<24x32xf32>
    %362 = arith.subf %356, %361 : vector<24x32xf32>
    %363 = arith.mulf %362, %362 : vector<24x32xf32>
    %cst_156 = arith.constant dense<0.000000e+00> : vector<24xf32>
    %364 = vector.multi_reduction <add>, %363, %cst_156 [1] : vector<24x32xf32> to vector<24xf32>
    %365 = vector.shape_cast %364 : vector<24xf32> to vector<24x1xf32>
    %cst_157 = arith.constant 3.200000e+01 : f32
    %366 = vector.broadcast %cst_157 : f32 to vector<24x1xf32>
    %367 = arith.divf %365, %366 : vector<24x1xf32>
    %cst_158 = arith.constant 9.99999996E-13 : f32
    %368 = vector.broadcast %cst_158 : f32 to vector<24x1xf32>
    %369 = arith.addf %367, %368 : vector<24x1xf32>
    %370 = math.rsqrt %369 : vector<24x1xf32>
    %371 = vector.broadcast %370 : vector<24x1xf32> to vector<24x32xf32>
    %372 = arith.mulf %362, %371 : vector<24x32xf32>
    %c0_159 = arith.constant 0 : index
    %c0_160 = arith.constant 0 : index
    %373 = vector.load %arg8[%c0_159, %c0_160] : memref<32x128xbf16, #tpu.memory_space<vmem>>, vector<32x128xbf16>
    %374 = arith.truncf %372 : vector<24x32xf32> to vector<24x32xbf16>
    %cst_161 = arith.constant dense<0.000000e+00> : vector<24x128xf32>
    %375 = tpu.matmul %374, %373, %cst_161 {dimension_numbers = #tpu.dot_dimension_numbers<[1], [0], [0], [1], [0, 0, 1, 1], [], []>} : vector<24x32xbf16>, vector<32x128xbf16>, vector<24x128xf32> -> vector<24x128xf32>
    %c0_162 = arith.constant 0 : index
    %c0_163 = arith.constant 0 : index
    %376 = vector.load %arg9[%c0_162, %c0_163] : memref<1x128xf32, #tpu.memory_space<vmem>>, vector<1x128xf32>
    %377 = vector.broadcast %376 : vector<1x128xf32> to vector<24x128xf32>
    %378 = arith.addf %375, %377 : vector<24x128xf32>
    %c0_164 = arith.constant 0 : index
    %c0_165 = arith.constant 0 : index
    %379 = vector.load %arg10[%c0_164, %c0_165] : memref<24x128xf32, #tpu.memory_space<vmem>>, vector<24x128xf32>
    tpu.vector_store %arg10[%c0_164, %c0_165], %378 {strides = array<i32>} : memref<24x128xf32, #tpu.memory_space<vmem>>, vector<24x128xf32>,
    return
  }
  func.func @transform_0(%arg0: i32) -> (i32, i32) {
    %c0_i32 = arith.constant 0 : i32
    %c0_i32_0 = arith.constant 0 : i32
    return %arg0, %c0_i32 : i32, i32
  }
  func.func @transform_1(%arg0: i32) -> (i32, i32) {
    %c0_i32 = arith.constant 0 : i32
    %c0_i32_0 = arith.constant 0 : i32
    %c0_i32_1 = arith.constant 0 : i32
    return %c0_i32, %c0_i32_0 : i32, i32
  }
  func.func @transform_2(%arg0: i32) -> (i32, i32) {
    %c0_i32 = arith.constant 0 : i32
    %c0_i32_0 = arith.constant 0 : i32
    %c0_i32_1 = arith.constant 0 : i32
    return %c0_i32, %c0_i32_0 : i32, i32
  }
  func.func @transform_3(%arg0: i32) -> (i32, i32, i32) {
    %c0_i32 = arith.constant 0 : i32
    %c0_i32_0 = arith.constant 0 : i32
    %c0_i32_1 = arith.constant 0 : i32
    %c0_i32_2 = arith.constant 0 : i32
    return %c0_i32, %c0_i32_0, %c0_i32_1 : i32, i32, i32
  }
  func.func @transform_4(%arg0: i32) -> (i32, i32, i32) {
    %c0_i32 = arith.constant 0 : i32
    %c0_i32_0 = arith.constant 0 : i32
    %c0_i32_1 = arith.constant 0 : i32
    %c0_i32_2 = arith.constant 0 : i32
    return %c0_i32, %c0_i32_0, %c0_i32_1 : i32, i32, i32
  }
  func.func @transform_5(%arg0: i32) -> (i32, i32, i32) {
    %c0_i32 = arith.constant 0 : i32
    %c0_i32_0 = arith.constant 0 : i32
    %c0_i32_1 = arith.constant 0 : i32
    %c0_i32_2 = arith.constant 0 : i32
    return %c0_i32, %c0_i32_0, %c0_i32_1 : i32, i32, i32
  }
  func.func @transform_6(%arg0: i32) -> (i32, i32, i32) {
    %c0_i32 = arith.constant 0 : i32
    %c0_i32_0 = arith.constant 0 : i32
    %c0_i32_1 = arith.constant 0 : i32
    %c0_i32_2 = arith.constant 0 : i32
    return %c0_i32, %c0_i32_0, %c0_i32_1 : i32, i32, i32
  }
  func.func @transform_7(%arg0: i32) -> (i32, i32) {
    %c0_i32 = arith.constant 0 : i32
    %c0_i32_0 = arith.constant 0 : i32
    %c0_i32_1 = arith.constant 0 : i32
    return %c0_i32, %c0_i32_0 : i32, i32
  }
  func.func @transform_8(%arg0: i32) -> (i32, i32) {
    %c0_i32 = arith.constant 0 : i32
    %c0_i32_0 = arith.constant 0 : i32
    %c0_i32_1 = arith.constant 0 : i32
    return %c0_i32, %c0_i32_0 : i32, i32
  }
  func.func @transform_9(%arg0: i32) -> (i32, i32) {
    %c0_i32 = arith.constant 0 : i32
    %c0_i32_0 = arith.constant 0 : i32
    return %arg0, %c0_i32 : i32, i32
  }
}

</mosaic_0001>

<bundles_post_ra>
// kernel: vit_forward.1
= control target key start
LH: loop header
LB: loop body
LE: loop exit
PB: predicated region body
PF: predicated region fallthrough
CT: control target
= control target key end

     0   :  { %s3175_s30 = smov 0   ;;  %s3640_s0 = inlined_call_operand.vmem [shape: f32[48,48], index: 0, kind: input, shape index: {}]   ;;  %s3641_s1 = inlined_call_operand.vmem [shape: f32[24,32], index: 1, kind: input, shape index: {}]   ;;  %s3642_s2 = inlined_call_operand.vmem [shape: bf16[48,32], index: 2, kind: input, shape index: {}]   ;;  %s3643_s3 = inlined_call_operand.vmem [shape: bf16[2,192,32], index: 3, kind: input, shape index: {}]   ;;  %s3644_s4 = inlined_call_operand.vmem [shape: bf16[2,32,64], index: 4, kind: input, shape index: {}]   ;;  %s3645_s5 = inlined_call_operand.vmem [shape: f32[2,5,32], index: 5, kind: input, shape index: {}]   ;;  %s3646_s6 = inlined_call_operand.vmem [shape: f32[2,1,64], index: 6, kind: input, shape index: {}]   ;;  %s3647_s7 = inlined_call_operand.vmem [shape: bf16[32,128], index: 7, kind: input, shape index: {}]   ;;  %s3648_s8 = inlined_call_operand.vmem [shape: f32[1,128], index: 8, kind: input, shape index: {}]   ;;  %s3649_s9 = inlined_call_operand.vmem [shape: f32[48,128], index: 9, kind: output, shape index: {}]  }
   0x1 LB: > { %s2534_s10 = sadd.s32 4294967295, %s3120_s30   ;;  %p2538_p0 = scmp.ge.s32.totalorder %s3120_s30, 1  ;;  %s3120_s30 = sphi %s3175_s30, %s19_s30  }
   0x2   : > { %p288_p1 = scmp.lt.s32.totalorder %s3120_s30, 3 }
   0x4   : > { %p289_p2 = pnand %p2538_p0, %p288_p1 }
   0x5   : > { %v2979_v0 = vld [vmem:[%s3642_s2] sm:$0xff] (!%p289_p2)   ;;  %s324_s13 = smul.u32 (!%p289_p2), 3, %s2534_s10  ;;  %v2980_v1 = vld [vmem:[%s3642_s2 + $0x8] sm:$0xff] (!%p289_p2)   ;;  %v2981_v2 = vld [vmem:[%s3642_s2 + $0x10] sm:$0xff] (!%p289_p2)   ;;  %vm369_vm0 = vcmask (!%p289_p2), 392192   ;;  %vm438_vm1 = vcmask (!%p289_p2), 261120   ;;  %v424_v59 = vlaneseq (!%p289_p2) }
   0x6   : > { %292 = sbr.rel (%p289_p2) target bundleno = 5448 (0x1548), region = 56  ;;  %2762 = vmatprep.subr.bf16.mxu0 (!%p289_p2), %v2979_v0  ;;  %v350_v8 = vld [vmem:[%s3641_s1 + $0x10] sm:$0xff] (!%p289_p2)  ;;  %v348_v9 = vld [vmem:[%s3641_s1] sm:$0xff] (!%p289_p2)  ;;  %v349_v13 = vld [vmem:[%s3641_s1 + $0x8] sm:$0xff] (!%p289_p2)  ;;  %vm907_vm6 = vcmask (!%p289_p2), 1043456   ;;  %vm761_vm8 = vcmask (!%p289_p2), 195584  }
   0x7   : > { %p325_p3 = scmp.lt.s32.totalorder (!%p289_p2), %s324_s13, 5  ;;  %2763 = vmatpush3.bf16.msra.mxu0 (!%p289_p2), %v2979_v0  ;;  %v2982_v36 = vld [vmem:[%s3643_s3] sm:$0xff] (!%p289_p2)   ;;  %v2984_v38 = vld [vmem:[%s3643_s3 + $0x8] sm:$0xff] (!%p289_p2)   ;;  %v2986_v40 = vld [vmem:[%s3643_s3 + $0x10] sm:$0xff] (!%p289_p2)   ;;  %v3251_v60 = vand.u32 (!%p289_p2), 127, %v424_v59  ;;  %vm1332_vm12 = vcmask (!%p289_p2), 523264  }
   0x8   : > { %2764 = vmatprep.subr.bf16.mxu0 (!%p289_p2), %v2980_v1  ;;  %v2983_v37 = vld [vmem:[%s3643_s3 + $0x20] sm:$0xff] (!%p289_p2)   ;;  %v2985_v39 = vld [vmem:[%s3643_s3 + $0x28] sm:$0xff] (!%p289_p2)   ;;  %2772 = vmatprep.subr.bf16.mxu1 (!%p289_p2), %v2982_v36  ;;  %v2987_v58 = vld [vmem:[%s3643_s3 + $0x18] sm:$0xff] (!%p289_p2)  }
   0x9   : > { %2773 = vmatpush3.bf16.msra.mxu1 (!%p289_p2), %v2982_v36  ;;  %vm433_vm2 = vcmp.ge.s32.totalorder (!%p289_p2), %v3251_v60, 16  ;;  %vm434_vm3 = vcmp.lt.s32.totalorder (!%p289_p2), %v3251_v60, 32  ;;  %v2548_v62 = vld [vmem:[%s3645_s5] ss:$0 sm:$0xff] (!%p289_p2)  ;;  %v2558_v0 = vld [vmem:[%s3645_s5 + $0x2] ss:$0 sm:$0xff] (!%p289_p2) }
   0xa   : > { %2774 = vmatprep.subr.bf16.mxu1 (!%p289_p2), %v2984_v38  ;;  %vm429_vm4 = vcmp.lt.s32.totalorder (!%p289_p2), %v3251_v60, 16  ;;  %vm435_vm5 = vmand (!%p289_p2), %vm433_vm2, %vm434_vm3  ;;  %vm426_vm7 = vcmp.lt.s32.totalorder (!%p289_p2), %v3251_v60, 17 }
   0xb   : > { %2765 = vmatpush3.bf16.msra.mxu0 (!%p289_p2), %v2980_v1 }
   0xc   : > { %2766 = vmatprep.subr.bf16.mxu0 (!%p289_p2), %v2981_v2 }
   0xd   : > { %s3651_s13 = smov (!%p325_p3, %s324_s13), 5  ;;  %2775 = vmatpush3.bf16.msra.mxu1 %v2984_v38 }
   0xe   : > { %s2539_s18 = sshll.u32 %s3651_s13, 3  ;;  %2780 = vmatprep.subr.bf16.mxu1 %v2986_v40 }
   0xf   : > { %s328_s21 = scalar_lea.vmem %s3640_s0, %s2539_s18  ;;  %2767 = vmatpush3.bf16.msra.mxu0 %v2981_v2  ;;  %s334_s26 = scalar_lea.vmem %s3649_s9, %s2539_s18 }
  0x10   : > { %v337_v3 = vld [vmem:[%s328_s21] sm:$0xff]  ;;  %v338_v4 = vld [vmem:[%s328_s21 + $0x8] sm:$0xff]  ;;  %v339_v5 = vld [vmem:[%s328_s21 + $0x10] sm:$0xff]  ;;  %2788 = vmatprep.subr.bf16.mxu0 %v2983_v37 }
  0x11   : > { %v346_v6 = vpack.c.bf16 %v338_v4, %v337_v3  ;;  %v347_v7 = vpack.c.bf16 %v339_v5, %v339_v5 }
  0x13   : > { %2768 = vmatprep.mubr.msk.bf16.mxu0 %vm369_vm0, %v346_v6 }
  0x14   : > { %2769 = vmatmul.mubr.msk.bf16.vlgmr.msra.gmra.mrb[0].mxu0 %vm369_vm0, %v347_v7 }
  0x15   : > { %2789 = vmatpush3.bf16.msra.mxu0 %v2983_v37 }
  0x16   : > { %2790 = vmatprep.subr.bf16.mxu0 %v2985_v39 }
  0x19   : > { %2791 = vmatpush3.bf16.msra.mxu0 %v2985_v39 }
  0xe7   : > { %v2770_v10 = vpop.f32.mrb[0].mxu0 }
  0xe8   : > { %v3206_v11 = vadd.f32 %v2770_v10, %v350_v8  ;;  %v410_v12 = vpop.f32.mrb[1].mxu0 }
  0xe9   : > { %v3211_v14 = vadd.f32 %v410_v12, %v348_v9  ;;  %v2771_v15 = vpop.f32.mrb[2].mxu0  ;;  %v3122_v9 = vmov 0.0  }
  0xea   : > { %v413_v16 = vpop.f32.mrb[3].mxu0  ;;  %v445_v17 = vsel %vm438_vm1, %v3206_v11, 0.0  ;;  %v3262_v10 = vsel %vm429_vm4, 1.0, %v3122_v9  ;;  %v3264_v12 = vsel %vm435_vm5, 1.0, %v3122_v9 }
  0xeb   : > { %v3215_v18 = vadd.f32 %v413_v16, %v349_v13  ;;  %446 = vadd.xlane.f32.xlu1 %v445_v17  ;;  %v439_v19 = vsel %vm438_vm1, %v3211_v14, 0.0 }
  0xec   : > { %440 = vadd.xlane.f32.xlu0 %v439_v19 }
  0xed   : > { %v442_v20 = vsel %vm438_vm1, %v3215_v18, 0.0 }
  0xf0   : > { %443 = vadd.xlane.f32.xlu0 %v442_v20 }
 0x178   : > { %v447_v21 = vpop.xlane.xlu1 %446 }
 0x179   : > { %v451_v22 = vmul.f32 0.03125, %v447_v21  ;;  %v441_v23 = vpop.xlane.xlu0 %440 }
 0x17a   : > { %v449_v24 = vmul.f32 0.03125, %v441_v23 }
 0x17b   : > { %v454_v25 = vsub.f32 %v3206_v11, %v451_v22 }
 0x17c   : > { %v452_v26 = vsub.f32 %v3211_v14, %v449_v24 }
 0x17d   : > { %v444_v27 = vpop.xlane.xlu0 %443  ;;  %v457_v32 = vmul.f32 %v454_v25, %v454_v25 }
 0x17e   : > { %v450_v28 = vmul.f32 0.03125, %v444_v27  ;;  %v455_v29 = vmul.f32 %v452_v26, %v452_v26 }
 0x17f   : > { %v464_v34 = vsel %vm438_vm1, %v457_v32, 0.0 }
 0x180   : > { %v453_v30 = vsub.f32 %v3215_v18, %v450_v28  ;;  %v458_v31 = vsel %vm438_vm1, %v455_v29, 0.0 }
 0x181   : > { %459 = vadd.xlane.f32.xlu1 %v458_v31 }
 0x182   : > { %v456_v33 = vmul.f32 %v453_v30, %v453_v30 }
 0x184   : > { %v461_v35 = vsel %vm438_vm1, %v456_v33, 0.0 }
 0x185   : > { %465 = vadd.xlane.f32.xlu1 %v464_v34  ;;  %462 = vadd.xlane.f32.xlu0 %v461_v35 }
 0x20e   : > { %v460_v41 = vpop.xlane.xlu1 %459 }
 0x20f   : > { %v467_v42 = vmul.f32 0.03125, %v460_v41 }
 0x211   : > { %v470_v43 = vadd.f32 1e-12, %v467_v42 }
 0x212   : > { %v466_v44 = vpop.xlane.xlu1 %465  ;;  %v463_v45 = vpop.xlane.xlu0 %462 }
 0x213   : > { %v469_v46 = vmul.f32 0.03125, %v466_v44  ;;  %v468_v47 = vmul.f32 0.03125, %v463_v45  ;;  %3012 = vrsqrt.f32 %v470_v43 }
 0x215   : > { %v472_v48 = vadd.f32 1e-12, %v469_v46  ;;  %v471_v49 = vadd.f32 1e-12, %v468_v47 }
 0x217   : > { %3014 = vrsqrt.f32 %v472_v48 }
 0x218   : > { %3016 = vrsqrt.f32 %v471_v49 }
 0x21d   : > { %v3013_v50 = vpop.eup %3012 }
 0x21e   : > { %v476_v54 = vmul.f32 %v3013_v50, %v452_v26  ;;  %v2553_v26 = vld [vmem:[%s3645_s5 + $0x1] ss:$0 sm:$0xff]  ;;  %v3123_v50 = vmov -1e+30  }
 0x221   : > { %v3015_v51 = vpop.eup %3014 }
 0x222   : > { %v3017_v52 = vpop.eup %3016  ;;  %v478_v53 = vmul.f32 %v3015_v51, %v454_v25  ;;  %v3299_v51 = vsel %vm426_vm7, 0.0, %v3123_v50 }
 0x223   : > { %v477_v55 = vmul.f32 %v3017_v52, %v453_v30 }
 0x224   : > { %v484_v56 = vpack.c.bf16 %v478_v53, %v478_v53 }
 0x225   : > { %v483_v57 = vpack.c.bf16 %v477_v55, %v476_v54 }
 0x227   : > { %2776 = vmatprep.mubr.msk.bf16.mxu1 %vm438_vm1, %v483_v57  ;;  %2792 = vmatprep.mubr.msk.bf16.mxu0 %vm438_vm1, %v483_v57 }
 0x228   : > { %2777 = vmatmul.mubr.msk.bf16.vlgmr.msra.gmra.mrb[0].mxu1 %vm438_vm1, %v484_v56  ;;  %2793 = vmatmul.mubr.msk.bf16.vlgmr.msra.gmra.mrb[4].mxu0 %vm438_vm1, %v484_v56 }
 0x229   : > { %2781 = vmatpush3.bf16.msra.mxu1 %v2986_v40  ;;  %2784 = vmatprep.mubr.msk.bf16.mxu1 %vm438_vm1, %v483_v57 }
 0x22a   : > { %2782 = vmatprep.subr.bf16.mxu1 %v2987_v58 }
 0x22d   : > { %2783 = vmatpush3.bf16.msra.mxu1 %v2987_v58 }
 0x230   : > { %2785 = vmatmul.mubr.msk.bf16.vlgmr.msra.gmra.mrb[4].mxu1 %vm438_vm1, %v484_v56 }
 0x2fb   : > { %v2778_v61 = vpop.f32.mrb[0].mxu1  ;;  %v2794_v63 = vpop.f32.mrb[4].mxu0 }
 0x2fc   : > { %v542_v1 = vpop.f32.mrb[1].mxu1  ;;  %v680_v2 = vpop.f32.mrb[5].mxu0  ;;  %v551_v40 = vadd.f32 %v2778_v61, %v2548_v62  ;;  %v3286_v41 = vadd.f32 %v2794_v63, %v2558_v0 }
 0x2fd   : > { %v2779_v3 = vpop.f32.mrb[2].mxu1  ;;  %v2795_v4 = vpop.f32.mrb[6].mxu0  ;;  %v543_v5 = vadd.f32 %v2548_v62, %v542_v1  ;;  %v681_v6 = vadd.f32 %v2558_v0, %v680_v2 }
 0x2fe   : > { %v545_v7 = vpop.f32.mrb[3].mxu1  ;;  %v683_v8 = vpop.f32.mrb[7].mxu0  ;;  %v698_v43 = vmul.f32 %v3262_v10, %v551_v40  ;;  %v804_v44 = vmul.f32 %v3264_v12, %v551_v40  ;;  %v896_v45 = vmul.f32 %v3264_v12, %v3286_v41 }
 0x2ff   : > { %v546_v13 = vadd.f32 %v2548_v62, %v545_v7  ;;  %v684_v15 = vadd.f32 %v2558_v0, %v683_v8  ;;  %v696_v16 = vmul.f32 %v3262_v10, %v543_v5  ;;  %v802_v17 = vmul.f32 %v3264_v12, %v543_v5 }
 0x300   : > { %v894_v19 = vmul.f32 %v3264_v12, %v681_v6  ;;  %v795_v25 = vmul.f32 %v3262_v10, %v681_v6  ;;  %v700_v46 = vpack.c.bf16 %v698_v43, %v698_v43  ;;  %v806_v47 = vpack.c.bf16 %v804_v44, %v804_v44 }
 0x301   : > { %v697_v20 = vmul.f32 %v3262_v10, %v546_v13  ;;  %v803_v21 = vmul.f32 %v3264_v12, %v546_v13  ;;  %v796_v22 = vmul.f32 %v3262_v10, %v684_v15  ;;  %v895_v23 = vmul.f32 %v3264_v12, %v684_v15 }
 0x302   : > { %v900_v48 = vpack.c.bf16 %v896_v45, %v896_v45  ;;  %v2988_v45 = vld [vmem:[%s3643_s3 + $0x30] sm:$0xff]  }
 0x303   : > { %v2786_v24 = vpop.f32.mrb[4].mxu1  ;;  %v699_v28 = vpack.c.bf16 %v697_v20, %v696_v16  ;;  %v805_v29 = vpack.c.bf16 %v803_v21, %v802_v17  ;;  %v899_v31 = vpack.c.bf16 %v895_v23, %v894_v19  ;;  %v3277_v33 = vpack.c.bf16 %v796_v22, %v795_v25 }
 0x304   : > { %v611_v27 = vpop.f32.mrb[5].mxu1  ;;  %v620_v34 = vadd.f32 %v2786_v24, %v2553_v26  ;;  %v909_v49 = vsel %vm907_vm6, %v900_v48, 0 }
 0x305   : > { %v2787_v30 = vpop.f32.mrb[6].mxu1  ;;  %v612_v35 = vadd.f32 %v2553_v26, %v611_v27  ;;  %2800 = vmatprep.mubr.msk.bf16.mxu1 %vm438_vm1, %v699_v28  ;;  %2808 = vmatprep.mubr.msk.bf16.mxu0 %vm438_vm1, %v805_v29 }
 0x306   : > { %v614_v32 = vpop.f32.mrb[7].mxu1  ;;  %v695_v38 = vpack.c.bf16 %v620_v34, %v620_v34 }
 0x307   : > { %v615_v36 = vadd.f32 %v2553_v26, %v614_v32 }
 0x308   : > { %v711_v42 = vsel %vm438_vm1, %v695_v38, 0 }
 0x309   : > { %v694_v37 = vpack.c.bf16 %v615_v36, %v612_v35 }
 0x30b   : > { %2956 = vmatprep.subr.msk.bf16.mxu1 %vm438_vm1, %v694_v37  ;;  %2958 = vmatprep.subr.msk.bf16.mxu0 %vm438_vm1, %v694_v37  ;;  %v708_v39 = vsel %vm438_vm1, %v694_v37, 0 }
 0x30c   : > { %2797 = vmatpush3.bf16.xpose.msra.mxu1 %v708_v39  ;;  %2805 = vmatpush3.bf16.xpose.msra.mxu0 %v708_v39 }
 0x30d   : > { %2957 = vmatprep.subr.msk.bf16.mxu1 %vm438_vm1, %v695_v38  ;;  %2959 = vmatprep.subr.msk.bf16.mxu0 %vm438_vm1, %v695_v38 }
 0x314   : > { %2799 = vmatpush3.bf16.xpose.msra.mxu1 %v711_v42  ;;  %2807 = vmatpush3.bf16.xpose.msra.mxu0 %v711_v42 }
 0x315   : > { %2812 = vmatprep.subr.bf16.mxu1 %v899_v31  ;;  %2828 = vmatprep.subr.bf16.mxu0 %v2988_v45 }
 0x31b   : > { %2801 = vmatmul.mubr.msk.bf16.vlgmr.msra.gmra.mrb[8].mxu1 %vm438_vm1, %v700_v46  ;;  %2809 = vmatmul.mubr.msk.bf16.vlgmr.msra.gmra.mrb[8].mxu0 %vm438_vm1, %v806_v47 }
 0x31c   : > { %2813 = vmatpush3.bf16.msra.mxu1 %v899_v31  ;;  %2829 = vmatpush3.bf16.msra.mxu0 %v2988_v45 }
 0x31d   : > { %2960 = vmatprep.subr.msk.bf16.mxu1 %vm907_vm6, %v900_v48 }
 0x320   : > { %2815 = vmatpush3.bf16.msra.mxu1 %v909_v49 }
 0x321   : > { %2820 = vmatprep.subr.bf16.mxu1 %v3277_v33 }
 0x3ee   : > { %v2802_v52 = vpop.f32.mrb[8].mxu1  ;;  %v2810_v53 = vpop.f32.mrb[8].mxu0 }
 0x3ef   : > { %v747_v54 = vpop.f32.mrb[9].mxu1  ;;  %v847_v55 = vpop.f32.mrb[9].mxu0  ;;  %v856_v62 = vadd.f32 %v2810_v53, %v3299_v51  ;;  %v756_v4 = vadd.f32 %v2802_v52, %v3299_v51 }
 0x3f0   : > { %v848_v56 = vadd.f32 %v847_v55, %v3299_v51  ;;  %v2803_v57 = vpop.f32.mrb[10].mxu1  ;;  %v2811_v58 = vpop.f32.mrb[10].mxu0  ;;  %v748_v0 = vadd.f32 %v747_v54, %v3299_v51 }
 0x3f1   : > { %v750_v59 = vpop.f32.mrb[11].mxu1  ;;  %v850_v61 = vpop.f32.mrb[11].mxu0  ;;  %v867_v3 = vsel %vm761_vm8, %v856_v62, -inf  ;;  %v768_v7 = vsel %vm761_vm8, %v756_v4, -inf  ;;  %v797_v58 = vmul.f32 %v3262_v10, %v3286_v41 }
 0x3f2   : > { %v851_v63 = vadd.f32 %v850_v61, %v3299_v51  ;;  %v861_v60 = vsel %vm761_vm8, %v848_v56, -inf  ;;  %v751_v2 = vadd.f32 %v750_v59, %v3299_v51  ;;  %v762_v5 = vsel %vm761_vm8, %v748_v0, -inf }
 0x3f3   : > { %862 = vmax.xlane.f32.xlu0 %v861_v60 }
 0x3f4   : > { %v864_v1 = vsel %vm761_vm8, %v851_v63, -inf  ;;  %v765_v6 = vsel %vm761_vm8, %v751_v2, -inf }
 0x3f5   : > { %865 = vmax.xlane.f32.xlu1 %v864_v1 }
 0x3f7   : > { %868 = vmax.xlane.f32.xlu0 %v867_v3 }
 0x3f9   : > { %763 = vmax.xlane.f32.xlu1 %v762_v5 }
 0x3fb   : > { %766 = vmax.xlane.f32.xlu0 %v765_v6 }
 0x3fd   : > { %769 = vmax.xlane.f32.xlu1 %v768_v7  ;;  %v2989_v7 = vld [vmem:[%s3643_s3 + $0x38] sm:$0xff]  }
 0x3fe   : > { %2830 = vmatprep.subr.bf16.mxu0 %v2989_v7 }
 0x3ff   : > { %2831 = vmatpush3.bf16.msra.mxu0 %v2989_v7 }
 0x480   : > { %v863_v8 = vpop.xlane.xlu0 %862 }
 0x481   : > { %v870_v9 = vsub.f32 %v848_v56, %v863_v8 }
 0x482   : > { %v866_v13 = vpop.xlane.xlu1 %865 }
 0x483   : > { %v873_v15 = vmul.f32 1.442695, %v870_v9  ;;  %v871_v16 = vsub.f32 %v851_v63, %v866_v13 }
 0x484   : > { %v869_v17 = vpop.xlane.xlu0 %868 }
 0x485   : > { %3018 = vpow2.f32 %v873_v15  ;;  %v875_v19 = vmul.f32 1.442695, %v871_v16  ;;  %v872_v20 = vsub.f32 %v856_v62, %v869_v17 }
 0x486   : > { %v764_v21 = vpop.xlane.xlu1 %763 }
 0x487   : > { %3020 = vpow2.f32 %v875_v19  ;;  %v877_v22 = vmul.f32 1.442695, %v872_v20  ;;  %v771_v23 = vsub.f32 %v748_v0, %v764_v21  ;;  %v801_v0 = vpack.c.bf16 %v797_v58, %v797_v58  ;;  %v2575_v19 = vld [vmem:[%s3645_s5 + $0x3] ss:$0 sm:$0xff] }
 0x488   : > { %v767_v24 = vpop.xlane.xlu0 %766 }
 0x489   : > { %3022 = vpow2.f32 %v877_v22  ;;  %v774_v25 = vmul.f32 1.442695, %v771_v23  ;;  %v772_v26 = vsub.f32 %v751_v2, %v767_v24  ;;  %v966_v41 = vsel %vm907_vm6, %v801_v0, 0 }
 0x48a   : > { %v770_v27 = vpop.xlane.xlu1 %769 }
 0x48b   : > { %3024 = vpow2.f32 %v774_v25  ;;  %v776_v28 = vmul.f32 1.442695, %v772_v26  ;;  %v773_v29 = vsub.f32 %v756_v4, %v770_v27 }
 0x48d   : > { %3026 = vpow2.f32 %v776_v28  ;;  %v778_v30 = vmul.f32 1.442695, %v773_v29 }
 0x48f   : > { %v3019_v31 = vpop.eup %3018  ;;  %3028 = vpow2.f32 %v778_v30 }
 0x490   : > { %v879_v32 = vsel %vm761_vm8, %v3019_v31, 0.0 }
 0x491   : > { %v3021_v34 = vpop.eup %3020  ;;  %880 = vadd.xlane.f32.xlu0 %v879_v32 }
 0x492   : > { %v882_v35 = vsel %vm761_vm8, %v3021_v34, 0.0 }
 0x493   : > { %v3023_v36 = vpop.eup %3022  ;;  %883 = vadd.xlane.f32.xlu1 %v882_v35 }
 0x494   : > { %v885_v37 = vsel %vm761_vm8, %v3023_v36, 0.0 }
 0x495   : > { %v3025_v38 = vpop.eup %3024  ;;  %886 = vadd.xlane.f32.xlu0 %v885_v37 }
 0x496   : > { %v780_v39 = vsel %vm761_vm8, %v3025_v38, 0.0 }
 0x497   : > { %v3027_v40 = vpop.eup %3026  ;;  %781 = vadd.xlane.f32.xlu1 %v780_v39 }
 0x498   : > { %v783_v42 = vsel %vm761_vm8, %v3027_v40, 0.0 }
 0x499   : > { %v3029_v43 = vpop.eup %3028  ;;  %784 = vadd.xlane.f32.xlu0 %v783_v42 }
 0x49a   : > { %v786_v44 = vsel %vm761_vm8, %v3029_v43, 0.0 }
 0x49b   : > { %787 = vadd.xlane.f32.xlu1 %v786_v44 }
 0x51e   : > { %v881_v46 = vpop.xlane.xlu0 %880 }
 0x51f   : > { %3030 = vrcp.f32 %v881_v46  ;;  %v2990_v46 = vld [vmem:[%s3644_s4] sm:$0xff]  }
 0x520   : > { %v884_v47 = vpop.xlane.xlu1 %883  ;;  %2836 = vmatprep.subr.bf16.mxu0 %v2990_v46 }
 0x521   : > { %3032 = vrcp.f32 %v884_v47  ;;  %v2991_v47 = vld [vmem:[%s3644_s4 + $0x8] sm:$0xff]  }
 0x522   : > { %v887_v48 = vpop.xlane.xlu0 %886 }
 0x523   : > { %3034 = vrcp.f32 %v887_v48 }
 0x524   : > { %v782_v49 = vpop.xlane.xlu1 %781 }
 0x525   : > { %3036 = vrcp.f32 %v782_v49 }
 0x526   : > { %v785_v50 = vpop.xlane.xlu0 %784 }
 0x527   : > { %3038 = vrcp.f32 %v785_v50 }
 0x528   : > { %v788_v52 = vpop.xlane.xlu1 %787 }
 0x529   : > { %v3031_v53 = vpop.eup %3030  ;;  %3040 = vrcp.f32 %v788_v52 }
 0x52a   : > { %v889_v55 = vmul.f32 %v3031_v53, %v3019_v31 }
 0x52b   : > { %v3033_v54 = vpop.eup %3032 }
 0x52c   : > { %v891_v56 = vmul.f32 %v3033_v54, %v3021_v34 }
 0x52d   : > { %v3035_v57 = vpop.eup %3034 }
 0x52e   : > { %v893_v59 = vmul.f32 %v3035_v57, %v3023_v36  ;;  %v897_v61 = vpack.c.bf16 %v891_v56, %v889_v55 }
 0x52f   : > { %v3037_v62 = vpop.eup %3036 }
 0x530   : > { %2816 = vmatprep.mubr.msk.bf16.mxu1 %vm761_vm8, %v897_v61  ;;  %v898_v63 = vpack.c.bf16 %v893_v59, %v893_v59  ;;  %v790_v1 = vmul.f32 %v3037_v62, %v3025_v38 }
 0x531   : > { %v3039_v60 = vpop.eup %3038 }
 0x532   : > { %2817 = vmatmul.mubr.msk.bf16.vlgmr.msra.gmra.mrb[12].mxu1 %vm761_vm8, %v898_v63  ;;  %v792_v2 = vmul.f32 %v3039_v60, %v3027_v40 }
 0x533   : > { %2821 = vmatpush3.bf16.msra.mxu1 %v3277_v33  ;;  %v3041_v4 = vpop.eup %3040 }
 0x534   : > { %2961 = vmatprep.subr.msk.bf16.mxu1 %vm907_vm6, %v801_v0  ;;  %v798_v3 = vpack.c.bf16 %v792_v2, %v790_v1  ;;  %v794_v5 = vmul.f32 %v3041_v4, %v3029_v43  ;;  %v2992_v2 = vld [vmem:[%s3643_s3 + $0x40] sm:$0xff]   ;;  %v2994_v4 = vld [vmem:[%s3643_s3 + $0x50] sm:$0xff]  }
 0x536   : > { %2824 = vmatprep.mubr.msk.bf16.mxu1 %vm761_vm8, %v798_v3  ;;  %v799_v6 = vpack.c.bf16 %v794_v5, %v794_v5  ;;  %v2993_v3 = vld [vmem:[%s3643_s3 + $0x48] sm:$0xff]   ;;  %v2576_v5 = vld [vmem:[%s3646_s6] ss:$0 sm:$0xff] }
 0x537   : > { %2823 = vmatpush3.bf16.msra.mxu1 %v966_v41  ;;  %v2995_v41 = vld [vmem:[%s3643_s3 + $0x58] sm:$0xff]  }
 0x538   : > { %2844 = vmatprep.subr.bf16.mxu1 %v2992_v2 }
 0x53e   : > { %2825 = vmatmul.mubr.msk.bf16.vlgmr.msra.gmra.mrb[12].mxu1 %vm761_vm8, %v799_v6 }
 0x53f   : > { %2845 = vmatpush3.bf16.msra.mxu1 %v2992_v2 }
 0x540   : > { %2846 = vmatprep.subr.bf16.mxu1 %v2993_v3 }
 0x543   : > { %2847 = vmatpush3.bf16.msra.mxu1 %v2993_v3 }
 0x544   : > { %2848 = vmatprep.subr.bf16.mxu1 %v2994_v4 }
 0x547   : > { %2849 = vmatpush3.bf16.msra.mxu1 %v2994_v4 }
 0x548   : > { %2850 = vmatprep.subr.bf16.mxu1 %v2995_v41 }
 0x54b   : > { %2851 = vmatpush3.bf16.msra.mxu1 %v2995_v41 }
 0x611   : > { %v2826_v33 = vpop.f32.mrb[12].mxu1 }
 0x612   : > { %v1002_v8 = vpop.f32.mrb[13].mxu1  ;;  %v1021_v16 = vpack.c.bf16 %v2826_v33, %v2826_v33 }
 0x613   : > { %v2827_v9 = vpop.f32.mrb[14].mxu1 }
 0x614   : > { %v1005_v13 = vpop.f32.mrb[15].mxu1 }
 0x615   : > { %v1020_v15 = vpack.c.bf16 %v1005_v13, %v1002_v8 }
 0x617   : > { %2832 = vmatprep.mubr.msk.bf16.mxu0 %vm438_vm1, %v1020_v15 }
 0x618   : > { %2833 = vmatmul.mubr.msk.bf16.vlgmr.msra.gmra.mrb[12].mxu0 %vm438_vm1, %v1021_v16 }
 0x619   : > { %2837 = vmatpush3.bf16.msra.mxu0 %v2990_v46 }
 0x61a   : > { %2838 = vmatprep.subr.bf16.mxu0 %v2991_v47 }
 0x61d   : > { %2839 = vmatpush3.bf16.msra.mxu0 %v2991_v47 }
 0x6eb   : > { %v2834_v17 = vpop.f32.mrb[12].mxu0 }
 0x6ec   : > { %v1074_v20 = vpop.f32.mrb[13].mxu0  ;;  %v1090_v21 = vadd.f32 %v2834_v17, %v3206_v11 }
 0x6ed   : > { %v1088_v22 = vadd.f32 %v1074_v20, %v3211_v14  ;;  %v2835_v23 = vpop.f32.mrb[14].mxu0 }
 0x6ee   : > { %v1077_v24 = vpop.f32.mrb[15].mxu0  ;;  %v3344_v27 = vadd.f32 %v2575_v19, %v1090_v21 }
 0x6ef   : > { %v3341_v25 = vadd.f32 %v2575_v19, %v1088_v22  ;;  %v1089_v26 = vadd.f32 %v1077_v24, %v3215_v18 }
 0x6f0   : > { %v1105_v11 = vsel %vm438_vm1, %v3344_v27, 0.0 }
 0x6f1   : > { %v3346_v28 = vadd.f32 %v2575_v19, %v1089_v26  ;;  %v1099_v29 = vsel %vm438_vm1, %v3341_v25, 0.0 }
 0x6f2   : > { %1100 = vadd.xlane.f32.xlu0 %v1099_v29 }
 0x6f3   : > { %v1102_v30 = vsel %vm438_vm1, %v3346_v28, 0.0 }
 0x6f4   : > { %1103 = vadd.xlane.f32.xlu1 %v1102_v30 }
 0x6f6   : > { %1106 = vadd.xlane.f32.xlu0 %v1105_v11 }
 0x77f   : > { %v1101_v14 = vpop.xlane.xlu0 %1100 }
 0x780   : > { %v1108_v31 = vmul.f32 0.03125, %v1101_v14 }
 0x781   : > { %v1104_v32 = vpop.xlane.xlu1 %1103 }
 0x782   : > { %v1111_v18 = vsub.f32 %v3341_v25, %v1108_v31  ;;  %v1109_v34 = vmul.f32 0.03125, %v1104_v32 }
 0x783   : > { %v1107_v35 = vpop.xlane.xlu0 %1106 }
 0x784   : > { %v1112_v36 = vsub.f32 %v3346_v28, %v1109_v34  ;;  %v1110_v37 = vmul.f32 0.03125, %v1107_v35  ;;  %v1114_v38 = vmul.f32 %v1111_v18, %v1111_v18 }
 0x786   : > { %v1113_v39 = vsub.f32 %v3344_v27, %v1110_v37  ;;  %v1117_v40 = vsel %vm438_vm1, %v1114_v38, 0.0  ;;  %v1115_v42 = vmul.f32 %v1112_v36, %v1112_v36 }
 0x787   : > { %1118 = vadd.xlane.f32.xlu1 %v1117_v40 }
 0x788   : > { %v1120_v43 = vsel %vm438_vm1, %v1115_v42, 0.0  ;;  %v1116_v44 = vmul.f32 %v1113_v39, %v1113_v39 }
 0x789   : > { %1121 = vadd.xlane.f32.xlu0 %v1120_v43 }
 0x78a   : > { %v1123_v45 = vsel %vm438_vm1, %v1116_v44, 0.0 }
 0x78b   : > { %1124 = vadd.xlane.f32.xlu1 %v1123_v45 }
 0x814   : > { %v1119_v48 = vpop.xlane.xlu1 %1118 }
 0x815   : > { %v1126_v49 = vmul.f32 0.03125, %v1119_v48 }
 0x816   : > { %v1122_v50 = vpop.xlane.xlu0 %1121 }
 0x817   : > { %v1129_v52 = vadd.f32 1e-12, %v1126_v49  ;;  %v1127_v53 = vmul.f32 0.03125, %v1122_v50 }
 0x818   : > { %v1125_v54 = vpop.xlane.xlu1 %1124 }
 0x819   : > { %3042 = vrsqrt.f32 %v1129_v52  ;;  %v1130_v55 = vadd.f32 1e-12, %v1127_v53  ;;  %v1128_v56 = vmul.f32 0.03125, %v1125_v54 }
 0x81b   : > { %3044 = vrsqrt.f32 %v1130_v55  ;;  %v1131_v57 = vadd.f32 1e-12, %v1128_v56 }
 0x81d   : > { %3046 = vrsqrt.f32 %v1131_v57 }
 0x823   : > { %v3043_v58 = vpop.eup %3042 }
 0x824   : > { %v1135_v61 = vmul.f32 %v3043_v58, %v1111_v18 }
 0x825   : > { %v3045_v59 = vpop.eup %3044 }
 0x826   : > { %v1136_v62 = vmul.f32 %v3045_v59, %v1112_v36 }
 0x827   : > { %v3047_v63 = vpop.eup %3046 }
 0x828   : > { %v1142_v60 = vpack.c.bf16 %v1136_v62, %v1135_v61  ;;  %v1137_v0 = vmul.f32 %v3047_v63, %v1113_v39 }
 0x82a   : > { %2840 = vmatprep.mubr.msk.bf16.mxu0 %vm438_vm1, %v1142_v60  ;;  %v1143_v1 = vpack.c.bf16 %v1137_v0, %v1137_v0 }
 0x82c   : > { %2841 = vmatmul.mubr.msk.bf16.vlgmr.msra.gmra.mrb[16].mxu0 %vm438_vm1, %v1143_v1 }
 0x8ff   : > { %v2842_v6 = vpop.f32.mrb[16].mxu0 }
 0x900   : > { %v3383_v7 = vadd.f32 %v2842_v6, %v2576_v5  ;;  %v1203_v33 = vpop.f32.mrb[17].mxu0 }
 0x901   : > { %v3385_v8 = vadd.f32 %v2576_v5, %v1203_v33  ;;  %v2843_v9 = vpop.f32.mrb[18].mxu0 }
 0x902   : > { %v3388_v13 = vmul.f32 0.70710677, %v3383_v7  ;;  %v1206_v15 = vpop.f32.mrb[19].mxu0 }
 0x903   : > { %v3391_v16 = vmul.f32 0.70710677, %v3385_v8  ;;  %v3393_v17 = vadd.f32 %v2576_v5, %v1206_v15 }
 0x904   : > { %v1231_v19 = vand.u32 2147483647, %v3388_v13  ;;  %vm1225_vm9 = vcmp.ge.f32.partialorder %v3388_v13, 0.0 }
 0x905   : > { %v1229_v20 = vand.u32 2147483647, %v3391_v16  ;;  %v3398_v22 = vmul.f32 0.70710677, %v3393_v17  ;;  %vm1223_vm10 = vcmp.ge.f32.partialorder %v3391_v16, 0.0 }
 0x906   : > { %v1234_v21 = vmul.f32 0.3275911, %v1231_v19  ;;  %v1273_v14 = vsub.f32 0.0, %v1231_v19 }
 0x907   : > { %v1232_v23 = vmul.f32 0.3275911, %v1229_v20  ;;  %v1230_v26 = vand.u32 2147483647, %v3398_v22  ;;  %v1271_v31 = vsub.f32 0.0, %v1229_v20  ;;  %vm1224_vm11 = vcmp.ge.f32.partialorder %v3398_v22, 0.0 }
 0x908   : > { %v1237_v24 = vadd.f32 1.0, %v1234_v21  ;;  %v1276_v18 = vmul.f32 %v1273_v14, %v1231_v19  ;;  %v3124_v21 = vmov -1.0  }
 0x909   : > { %v1235_v29 = vadd.f32 1.0, %v1232_v23  ;;  %v1233_v30 = vmul.f32 0.3275911, %v1230_v26  ;;  %v1272_v34 = vsub.f32 0.0, %v1230_v26  ;;  %v1274_v37 = vmul.f32 %v1271_v31, %v1229_v20 }
 0x90a   : > { %3048 = vrcp.f32 %v1237_v24  ;;  %v1281_v42 = vmul.f32 1.442695, %v1276_v18  ;;  %v1228_v23 = vsel %vm1225_vm9, 1.0, %v3124_v21  ;;  %v1227_v31 = vsel %vm1224_vm11, 1.0, %v3124_v21 }
 0x90b   : > { %3050 = vrcp.f32 %v1235_v29  ;;  %v1236_v11 = vadd.f32 1.0, %v1233_v30  ;;  %v1275_v44 = vmul.f32 %v1272_v34, %v1230_v26  ;;  %v1277_v46 = vmul.f32 1.442695, %v1274_v37 }
 0x90c   : > { %v1226_v29 = vsel %vm1223_vm10, 1.0, %v3124_v21  ;;  %v1219_v18 = vmul.f32 0.5, %v3383_v7  ;;  %v1217_v34 = vmul.f32 0.5, %v3385_v8  ;;  %v2587_v7 = vld [vmem:[%s3645_s5 + $0x4] ss:$0 sm:$0xff] }
 0x90d   : > { %3052 = vrcp.f32 %v1236_v11  ;;  %v1279_v53 = vmul.f32 1.442695, %v1275_v44 }
 0x90e   : > { %3054 = vpow2.f32 %v1281_v42 }
 0x90f   : > { %3056 = vpow2.f32 %v1277_v46 }
 0x910   : > { %3058 = vpow2.f32 %v1279_v53 }
 0x914   : > { %v3049_v32 = vpop.eup %3048 }
 0x915   : > { %v3051_v35 = vpop.eup %3050  ;;  %v1246_v36 = vmul.f32 1.0614054, %v3049_v32 }
 0x916   : > { %v1244_v38 = vmul.f32 1.0614054, %v3051_v35 }
 0x917   : > { %v1249_v39 = vadd.f32 -1.4531521, %v1246_v36  ;;  %v3053_v40 = vpop.eup %3052 }
 0x918   : > { %v1247_v43 = vadd.f32 -1.4531521, %v1244_v38  ;;  %v1245_v47 = vmul.f32 1.0614054, %v3053_v40  ;;  %v3055_v4 = vpop.eup %3054 }
 0x919   : > { %v1252_v45 = vmul.f32 %v3049_v32, %v1249_v39  ;;  %v3057_v5 = vpop.eup %3056 }
 0x91a   : > { %v1250_v48 = vmul.f32 %v3051_v35, %v1247_v43  ;;  %v1248_v50 = vadd.f32 -1.4531521, %v1245_v47  ;;  %v3059_v20 = vpop.eup %3058 }
 0x91b   : > { %v1255_v49 = vadd.f32 1.4214138, %v1252_v45 }
 0x91c   : > { %v1253_v52 = vadd.f32 1.4214138, %v1250_v48  ;;  %v1251_v55 = vmul.f32 %v3053_v40, %v1248_v50 }
 0x91d   : > { %v1258_v54 = vmul.f32 %v3049_v32, %v1255_v49 }
 0x91e   : > { %v1256_v56 = vmul.f32 %v3051_v35, %v1253_v52  ;;  %v1254_v58 = vadd.f32 1.4214138, %v1251_v55 }
 0x91f   : > { %v1261_v57 = vadd.f32 -0.28449672, %v1258_v54 }
 0x920   : > { %v1259_v59 = vadd.f32 -0.28449672, %v1256_v56  ;;  %v1257_v62 = vmul.f32 %v3053_v40, %v1254_v58 }
 0x921   : > { %v1264_v61 = vmul.f32 %v3049_v32, %v1261_v57 }
 0x922   : > { %v1262_v63 = vmul.f32 %v3051_v35, %v1259_v59  ;;  %v1260_v0 = vadd.f32 -0.28449672, %v1257_v62 }
 0x923   : > { %v1267_v60 = vadd.f32 0.2548296, %v1264_v61 }
 0x924   : > { %v1265_v1 = vadd.f32 0.2548296, %v1262_v63  ;;  %v1263_v3 = vmul.f32 %v3053_v40, %v1260_v0 }
 0x925   : > { %v1270_v2 = vmul.f32 %v3049_v32, %v1267_v60 }
 0x926   : > { %v1268_v41 = vmul.f32 %v3051_v35, %v1265_v1  ;;  %v1266_v33 = vadd.f32 0.2548296, %v1263_v3  ;;  %v1218_v35 = vmul.f32 0.5, %v3393_v17  ;;  %v2997_v3 = vld [vmem:[%s3643_s3 + $0x80] sm:$0xff]  }
 0x927   : > { %v1285_v6 = vmul.f32 %v3055_v4, %v1270_v2  ;;  %v2996_v2 = vld [vmem:[%s3643_s3 + $0x60] sm:$0xff]   ;;  %v2998_v4 = vld [vmem:[%s3643_s3 + $0x68] sm:$0xff]   ;;  %2872 = vmatprep.subr.bf16.mxu1 %v2997_v3 }
 0x928   : > { %v1283_v9 = vmul.f32 %v3057_v5, %v1268_v41  ;;  %v1269_v19 = vmul.f32 %v3053_v40, %v1266_v33  ;;  %v2999_v41 = vld [vmem:[%s3643_s3 + $0x88] sm:$0xff]   ;;  %2856 = vmatprep.subr.bf16.mxu0 %v2996_v2  ;;  %v3000_v5 = vld [vmem:[%s3643_s3 + $0x70] sm:$0xff]  }
 0x929   : > { %v1288_v15 = vsub.f32 1.0, %v1285_v6  ;;  %2857 = vmatpush3.bf16.msra.mxu0 %v2996_v2 }
 0x92a   : > { %v1286_v24 = vsub.f32 1.0, %v1283_v9  ;;  %v1284_v30 = vmul.f32 %v3059_v20, %v1269_v19  ;;  %2858 = vmatprep.subr.bf16.mxu0 %v2998_v4 }
 0x92b   : > { %v1291_v26 = vmul.f32 %v1288_v15, %v1228_v23 }
 0x92c   : > { %v1289_v11 = vmul.f32 %v1286_v24, %v1226_v29  ;;  %v1287_v13 = vsub.f32 1.0, %v1284_v30 }
 0x92d   : > { %v1294_v14 = vadd.f32 1.0, %v1291_v26  ;;  %2859 = vmatpush3.bf16.msra.mxu0 %v2998_v4 }
 0x92e   : > { %v1292_v16 = vadd.f32 1.0, %v1289_v11  ;;  %v1290_v32 = vmul.f32 %v1287_v13, %v1227_v31  ;;  %2864 = vmatprep.subr.bf16.mxu0 %v3000_v5 }
 0x92f   : > { %v1297_v37 = vmul.f32 %v1294_v14, %v1219_v18  ;;  %v3001_v18 = vld [vmem:[%s3643_s3 + $0x78] sm:$0xff]  }
 0x930   : > { %v1293_v36 = vadd.f32 1.0, %v1290_v32  ;;  %v1295_v38 = vmul.f32 %v1292_v16, %v1217_v34 }
 0x931   : > { %v1307_v40 = vpack.c.bf16 %v1297_v37, %v1297_v37  ;;  %v2613_v37 = vld [vmem:[%s3645_s5 + $0xa] ss:$0 sm:$0xff] }
 0x932   : > { %v1296_v39 = vmul.f32 %v1293_v36, %v1218_v35  ;;  %v2593_v35 = vld [vmem:[%s3645_s5 + $0x8] ss:$0 sm:$0xff] }
 0x934   : > { %v1306_v22 = vpack.c.bf16 %v1296_v39, %v1295_v38 }
 0x936   : > { %2852 = vmatprep.mubr.msk.bf16.mxu1 %vm1332_vm12, %v1306_v22 }
 0x937   : > { %2853 = vmatmul.mubr.msk.bf16.vlgmr.msra.gmra.mrb[16].mxu1 %vm1332_vm12, %v1307_v40 }
 0x938   : > { %2873 = vmatpush3.bf16.msra.mxu1 %v2997_v3 }
 0x939   : > { %2874 = vmatprep.subr.bf16.mxu1 %v2999_v41 }
 0x93c   : > { %2875 = vmatpush3.bf16.msra.mxu1 %v2999_v41 }
 0xa0a   : > { %v2854_v42 = vpop.f32.mrb[16].mxu1 }
 0xa0b   : > { %v1373_v43 = vpop.f32.mrb[17].mxu1  ;;  %v1389_v8 = vadd.f32 %v2854_v42, %v3344_v27 }
 0xa0c   : > { %v1387_v17 = vadd.f32 %v1373_v43, %v3341_v25  ;;  %v2855_v44 = vpop.f32.mrb[18].mxu1 }
 0xa0d   : > { %v1376_v45 = vpop.f32.mrb[19].mxu1  ;;  %v3420_v48 = vadd.f32 %v2587_v7, %v1389_v8 }
 0xa0e   : > { %v3417_v46 = vadd.f32 %v2587_v7, %v1387_v17  ;;  %v1388_v47 = vadd.f32 %v1376_v45, %v3346_v28 }
 0xa0f   : > { %v1404_v25 = vsel %vm438_vm1, %v3420_v48, 0.0 }
 0xa10   : > { %v3422_v49 = vadd.f32 %v2587_v7, %v1388_v47  ;;  %v1398_v50 = vsel %vm438_vm1, %v3417_v46, 0.0 }
 0xa11   : > { %1399 = vadd.xlane.f32.xlu0 %v1398_v50 }
 0xa12   : > { %v1401_v52 = vsel %vm438_vm1, %v3422_v49, 0.0 }
 0xa13   : > { %1402 = vadd.xlane.f32.xlu1 %v1401_v52 }
 0xa15   : > { %1405 = vadd.xlane.f32.xlu0 %v1404_v25 }
 0xa9e   : > { %v1400_v27 = vpop.xlane.xlu0 %1399 }
 0xa9f   : > { %v1407_v53 = vmul.f32 0.03125, %v1400_v27 }
 0xaa0   : > { %v1403_v54 = vpop.xlane.xlu1 %1402 }
 0xaa1   : > { %v1410_v28 = vsub.f32 %v3417_v46, %v1407_v53  ;;  %v1408_v55 = vmul.f32 0.03125, %v1403_v54 }
 0xaa2   : > { %v1406_v56 = vpop.xlane.xlu0 %1405 }
 0xaa3   : > { %v1411_v57 = vsub.f32 %v3422_v49, %v1408_v55  ;;  %v1409_v58 = vmul.f32 0.03125, %v1406_v56  ;;  %v1413_v59 = vmul.f32 %v1410_v28, %v1410_v28  ;;  %v2603_v55 = vld [vmem:[%s3645_s5 + $0x9] ss:$0 sm:$0xff] }
 0xaa5   : > { %v1412_v61 = vsub.f32 %v3420_v48, %v1409_v58  ;;  %v1416_v62 = vsel %vm438_vm1, %v1413_v59, 0.0  ;;  %v1414_v63 = vmul.f32 %v1411_v57, %v1411_v57 }
 0xaa6   : > { %1417 = vadd.xlane.f32.xlu1 %v1416_v62 }
 0xaa7   : > { %v1419_v60 = vsel %vm438_vm1, %v1414_v63, 0.0  ;;  %v1415_v0 = vmul.f32 %v1412_v61, %v1412_v61 }
 0xaa8   : > { %1420 = vadd.xlane.f32.xlu0 %v1419_v60 }
 0xaa9   : > { %v1422_v1 = vsel %vm438_vm1, %v1415_v0, 0.0 }
 0xaaa   : > { %1423 = vadd.xlane.f32.xlu1 %v1422_v1 }
 0xb33   : > { %v1418_v6 = vpop.xlane.xlu1 %1417 }
 0xb34   : > { %v1425_v33 = vmul.f32 0.03125, %v1418_v6 }
 0xb35   : > { %v1421_v9 = vpop.xlane.xlu0 %1420 }
 0xb36   : > { %v1428_v15 = vadd.f32 1e-12, %v1425_v33  ;;  %v1426_v19 = vmul.f32 0.03125, %v1421_v9 }
 0xb37   : > { %v1424_v20 = vpop.xlane.xlu1 %1423 }
 0xb38   : > { %3060 = vrsqrt.f32 %v1428_v15  ;;  %v1429_v23 = vadd.f32 1e-12, %v1426_v19  ;;  %v1427_v24 = vmul.f32 0.03125, %v1424_v20 }
 0xb3a   : > { %3062 = vrsqrt.f32 %v1429_v23  ;;  %v1430_v26 = vadd.f32 1e-12, %v1427_v24 }
 0xb3c   : > { %3064 = vrsqrt.f32 %v1430_v26 }
 0xb42   : > { %v3061_v29 = vpop.eup %3060 }
 0xb43   : > { %v1434_v11 = vmul.f32 %v3061_v29, %v1410_v28 }
 0xb44   : > { %v3063_v30 = vpop.eup %3062 }
 0xb45   : > { %v1435_v13 = vmul.f32 %v3063_v30, %v1411_v57 }
 0xb46   : > { %v3065_v14 = vpop.eup %3064 }
 0xb47   : > { %v1442_v31 = vpack.c.bf16 %v1435_v13, %v1434_v11  ;;  %v1436_v16 = vmul.f32 %v3065_v14, %v1412_v61 }
 0xb49   : > { %2860 = vmatprep.mubr.msk.bf16.mxu0 %vm438_vm1, %v1442_v31  ;;  %2876 = vmatprep.mubr.msk.bf16.mxu1 %vm438_vm1, %v1442_v31  ;;  %v1443_v32 = vpack.c.bf16 %v1436_v16, %v1436_v16 }
 0xb4b   : > { %2861 = vmatmul.mubr.msk.bf16.vlgmr.msra.gmra.mrb[20].mxu0 %vm438_vm1, %v1443_v32  ;;  %2877 = vmatmul.mubr.msk.bf16.vlgmr.msra.gmra.mrb[20].mxu1 %vm438_vm1, %v1443_v32 }
 0xb4c   : > { %2865 = vmatpush3.bf16.msra.mxu0 %v3000_v5  ;;  %2868 = vmatprep.mubr.msk.bf16.mxu0 %vm438_vm1, %v1442_v31 }
 0xb4d   : > { %2866 = vmatprep.subr.bf16.mxu0 %v3001_v18 }
 0xb50   : > { %2867 = vmatpush3.bf16.msra.mxu0 %v3001_v18 }
 0xb53   : > { %2869 = vmatmul.mubr.msk.bf16.vlgmr.msra.gmra.mrb[24].mxu0 %vm438_vm1, %v1443_v32 }
 0xc1e   : > { %v2862_v34 = vpop.f32.mrb[20].mxu0  ;;  %v2878_v36 = vpop.f32.mrb[20].mxu1 }
 0xc1f   : > { %v1502_v38 = vpop.f32.mrb[21].mxu0  ;;  %v1640_v39 = vpop.f32.mrb[21].mxu1  ;;  %v1511_v41 = vadd.f32 %v2862_v34, %v2593_v35  ;;  %v3486_v5 = vadd.f32 %v2878_v36, %v2613_v37 }
 0xc20   : > { %v2863_v22 = vpop.f32.mrb[22].mxu0  ;;  %v2879_v40 = vpop.f32.mrb[22].mxu1  ;;  %v1503_v42 = vadd.f32 %v2593_v35, %v1502_v38  ;;  %v1641_v7 = vadd.f32 %v2613_v37, %v1640_v39 }
 0xc21   : > { %v1505_v43 = vpop.f32.mrb[23].mxu0  ;;  %v1643_v8 = vpop.f32.mrb[23].mxu1  ;;  %v1658_v33 = vmul.f32 %v3262_v10, %v1511_v41  ;;  %v1763_v9 = vmul.f32 %v3264_v12, %v1511_v41  ;;  %v1855_v15 = vmul.f32 %v3264_v12, %v3486_v5 }
 0xc22   : > { %v1506_v17 = vadd.f32 %v2593_v35, %v1505_v43  ;;  %v1644_v44 = vadd.f32 %v2613_v37, %v1643_v8  ;;  %v1656_v45 = vmul.f32 %v3262_v10, %v1503_v42  ;;  %v1761_v47 = vmul.f32 %v3264_v12, %v1503_v42 }
 0xc23   : > { %v1853_v50 = vmul.f32 %v3264_v12, %v1641_v7  ;;  %v1754_v28 = vmul.f32 %v3262_v10, %v1641_v7  ;;  %v1660_v19 = vpack.c.bf16 %v1658_v33, %v1658_v33  ;;  %v1765_v20 = vpack.c.bf16 %v1763_v9, %v1763_v9  ;;  %v3002_v33 = vld [vmem:[%s3643_s3 + $0x90] sm:$0xff]  }
 0xc24   : > { %v1657_v52 = vmul.f32 %v3262_v10, %v1506_v17  ;;  %v1762_v25 = vmul.f32 %v3264_v12, %v1506_v17  ;;  %v1755_v27 = vmul.f32 %v3262_v10, %v1644_v44  ;;  %v1854_v53 = vmul.f32 %v3264_v12, %v1644_v44 }
 0xc25   : > { %v1859_v23 = vpack.c.bf16 %v1855_v15, %v1855_v15 }
 0xc26   : > { %v2870_v54 = vpop.f32.mrb[24].mxu0  ;;  %v1659_v57 = vpack.c.bf16 %v1657_v52, %v1656_v45  ;;  %v1764_v58 = vpack.c.bf16 %v1762_v25, %v1761_v47  ;;  %v1858_v61 = vpack.c.bf16 %v1854_v53, %v1853_v50  ;;  %v3477_v63 = vpack.c.bf16 %v1755_v27, %v1754_v28 }
 0xc27   : > { %v1571_v56 = vpop.f32.mrb[25].mxu0  ;;  %v1580_v60 = vadd.f32 %v2870_v54, %v2603_v55  ;;  %v1867_v24 = vsel %vm907_vm6, %v1859_v23, 0 }
 0xc28   : > { %v2871_v59 = vpop.f32.mrb[26].mxu0  ;;  %v1572_v0 = vadd.f32 %v2603_v55, %v1571_v56  ;;  %2884 = vmatprep.mubr.msk.bf16.mxu0 %vm438_vm1, %v1659_v57  ;;  %2892 = vmatprep.mubr.msk.bf16.mxu1 %vm438_vm1, %v1764_v58 }
 0xc29   : > { %v1574_v62 = vpop.f32.mrb[27].mxu0  ;;  %v1655_v3 = vpack.c.bf16 %v1580_v60, %v1580_v60 }
 0xc2a   : > { %v1575_v1 = vadd.f32 %v2603_v55, %v1574_v62 }
 0xc2b   : > { %v1671_v6 = vsel %vm438_vm1, %v1655_v3, 0 }
 0xc2c   : > { %v1654_v2 = vpack.c.bf16 %v1575_v1, %v1572_v0 }
 0xc2e   : > { %2962 = vmatprep.subr.msk.bf16.mxu0 %vm438_vm1, %v1654_v2  ;;  %2964 = vmatprep.subr.msk.bf16.mxu1 %vm438_vm1, %v1654_v2  ;;  %v1668_v4 = vsel %vm438_vm1, %v1654_v2, 0 }
 0xc2f   : > { %2881 = vmatpush3.bf16.xpose.msra.mxu0 %v1668_v4  ;;  %2889 = vmatpush3.bf16.xpose.msra.mxu1 %v1668_v4 }
 0xc30   : > { %2963 = vmatprep.subr.msk.bf16.mxu0 %vm438_vm1, %v1655_v3  ;;  %2965 = vmatprep.subr.msk.bf16.mxu1 %vm438_vm1, %v1655_v3 }
 0xc37   : > { %2883 = vmatpush3.bf16.xpose.msra.mxu0 %v1671_v6  ;;  %2891 = vmatpush3.bf16.xpose.msra.mxu1 %v1671_v6 }
 0xc38   : > { %2896 = vmatprep.subr.bf16.mxu0 %v1858_v61  ;;  %2912 = vmatprep.subr.bf16.mxu1 %v3002_v33 }
 0xc3e   : > { %2885 = vmatmul.mubr.msk.bf16.vlgmr.msra.gmra.mrb[28].mxu0 %vm438_vm1, %v1660_v19  ;;  %2893 = vmatmul.mubr.msk.bf16.vlgmr.msra.gmra.mrb[24].mxu1 %vm438_vm1, %v1765_v20 }
 0xc3f   : > { %2897 = vmatpush3.bf16.msra.mxu0 %v1858_v61  ;;  %2913 = vmatpush3.bf16.msra.mxu1 %v3002_v33  ;;  %v3005_v33 = vld [vmem:[%s3644_s4 + $0x18] sm:$0xff]  }
 0xc40   : > { %2966 = vmatprep.subr.msk.bf16.mxu0 %vm907_vm6, %v1859_v23 }
 0xc43   : > { %2899 = vmatpush3.bf16.msra.mxu0 %v1867_v24 }
 0xc44   : > { %2904 = vmatprep.subr.bf16.mxu0 %v3477_v63 }
 0xd11   : > { %v2886_v26 = vpop.f32.mrb[28].mxu0  ;;  %v2894_v29 = vpop.f32.mrb[24].mxu1 }
 0xd12   : > { %v1707_v30 = vpop.f32.mrb[29].mxu0  ;;  %v1806_v11 = vpop.f32.mrb[25].mxu1  ;;  %v1815_v32 = vadd.f32 %v2894_v29, %v3299_v51  ;;  %v1716_v39 = vadd.f32 %v2886_v26, %v3299_v51 }
 0xd13   : > { %v1807_v12 = vadd.f32 %v1806_v11, %v3299_v51  ;;  %v2887_v13 = vpop.f32.mrb[30].mxu0  ;;  %v2895_v14 = vpop.f32.mrb[26].mxu1  ;;  %v1708_v35 = vadd.f32 %v1707_v30, %v3299_v51 }
 0xd14   : > { %v1710_v31 = vpop.f32.mrb[31].mxu0  ;;  %v1809_v16 = vpop.f32.mrb[27].mxu1  ;;  %v1826_v38 = vsel %vm761_vm8, %v1815_v32, -inf  ;;  %v1727_v42 = vsel %vm761_vm8, %v1716_v39, -inf  ;;  %v1756_v13 = vmul.f32 %v3262_v10, %v3486_v5 }
 0xd15   : > { %v1810_v18 = vadd.f32 %v1809_v16, %v3299_v51  ;;  %v1820_v34 = vsel %vm761_vm8, %v1807_v12, -inf  ;;  %v1711_v37 = vadd.f32 %v1710_v31, %v3299_v51  ;;  %v1721_v22 = vsel %vm761_vm8, %v1708_v35, -inf }
 0xd16   : > { %1821 = vmax.xlane.f32.xlu0 %v1820_v34  ;;  %v1760_v34 = vpack.c.bf16 %v1756_v13, %v1756_v13 }
 0xd17   : > { %v1823_v36 = vsel %vm761_vm8, %v1810_v18, -inf  ;;  %v1724_v40 = vsel %vm761_vm8, %v1711_v37, -inf }
 0xd18   : > { %1824 = vmax.xlane.f32.xlu1 %v1823_v36  ;;  %v1924_v10 = vsel %vm907_vm6, %v1760_v34, 0 }
 0xd1a   : > { %1827 = vmax.xlane.f32.xlu0 %v1826_v38 }
 0xd1c   : > { %1722 = vmax.xlane.f32.xlu1 %v1721_v22  ;;  %v3003_v22 = vld [vmem:[%s3643_s3 + $0x98] sm:$0xff]  }
 0xd1d   : > { %2914 = vmatprep.subr.bf16.mxu1 %v3003_v22 }
 0xd1e   : > { %1725 = vmax.xlane.f32.xlu0 %v1724_v40  ;;  %2915 = vmatpush3.bf16.msra.mxu1 %v3003_v22 }
 0xd20   : > { %1728 = vmax.xlane.f32.xlu1 %v1727_v42 }
 0xda3   : > { %v1822_v7 = vpop.xlane.xlu0 %1821 }
 0xda4   : > { %v1829_v43 = vsub.f32 %v1807_v12, %v1822_v7 }
 0xda5   : > { %v1825_v8 = vpop.xlane.xlu1 %1824 }
 0xda6   : > { %v1832_v17 = vmul.f32 1.442695, %v1829_v43  ;;  %v1830_v44 = vsub.f32 %v1810_v18, %v1825_v8 }
 0xda7   : > { %v1828_v45 = vpop.xlane.xlu0 %1827 }
 0xda8   : > { %3066 = vpow2.f32 %v1832_v17  ;;  %v1834_v47 = vmul.f32 1.442695, %v1830_v44  ;;  %v1831_v50 = vsub.f32 %v1815_v32, %v1828_v45  ;;  %v2635_v44 = vld [vmem:[%s3645_s5 + $0xb] ss:$0 sm:$0xff] }
 0xda9   : > { %v1723_v52 = vpop.xlane.xlu1 %1722 }
 0xdaa   : > { %3068 = vpow2.f32 %v1834_v47  ;;  %v1836_v51 = vmul.f32 1.442695, %v1831_v50  ;;  %v1730_v25 = vsub.f32 %v1708_v35, %v1723_v52 }
 0xdab   : > { %v1726_v27 = vpop.xlane.xlu0 %1725 }
 0xdac   : > { %3070 = vpow2.f32 %v1836_v51  ;;  %v1733_v53 = vmul.f32 1.442695, %v1730_v25  ;;  %v1731_v54 = vsub.f32 %v1711_v37, %v1726_v27 }
 0xdad   : > { %v1729_v28 = vpop.xlane.xlu1 %1728 }
 0xdae   : > { %3072 = vpow2.f32 %v1733_v53  ;;  %v1735_v55 = vmul.f32 1.442695, %v1731_v54  ;;  %v1732_v56 = vsub.f32 %v1716_v39, %v1729_v28 }
 0xdb0   : > { %3074 = vpow2.f32 %v1735_v55  ;;  %v1737_v57 = vmul.f32 1.442695, %v1732_v56 }
 0xdb2   : > { %v3067_v58 = vpop.eup %3066  ;;  %3076 = vpow2.f32 %v1737_v57 }
 0xdb3   : > { %v1838_v59 = vsel %vm761_vm8, %v3067_v58, 0.0 }
 0xdb4   : > { %v3069_v61 = vpop.eup %3068  ;;  %1839 = vadd.xlane.f32.xlu0 %v1838_v59 }
 0xdb5   : > { %v1841_v62 = vsel %vm761_vm8, %v3069_v61, 0.0 }
 0xdb6   : > { %v3071_v60 = vpop.eup %3070  ;;  %1842 = vadd.xlane.f32.xlu1 %v1841_v62 }
 0xdb7   : > { %v1844_v0 = vsel %vm761_vm8, %v3071_v60, 0.0 }
 0xdb8   : > { %v3073_v1 = vpop.eup %3072  ;;  %1845 = vadd.xlane.f32.xlu0 %v1844_v0 }
 0xdb9   : > { %v1739_v2 = vsel %vm761_vm8, %v3073_v1, 0.0 }
 0xdba   : > { %v3075_v3 = vpop.eup %3074  ;;  %1740 = vadd.xlane.f32.xlu1 %v1739_v2 }
 0xdbb   : > { %v1742_v4 = vsel %vm761_vm8, %v3075_v3, 0.0 }
 0xdbc   : > { %v3077_v41 = vpop.eup %3076  ;;  %1743 = vadd.xlane.f32.xlu0 %v1742_v4 }
 0xdbd   : > { %v1745_v6 = vsel %vm761_vm8, %v3077_v41, 0.0 }
 0xdbe   : > { %1746 = vadd.xlane.f32.xlu1 %v1745_v6  ;;  %v3004_v6 = vld [vmem:[%s3644_s4 + $0x10] sm:$0xff]  }
 0xdbf   : > { %2920 = vmatprep.subr.bf16.mxu1 %v3004_v6 }
 0xe41   : > { %v1840_v9 = vpop.xlane.xlu0 %1839 }
 0xe42   : > { %3078 = vrcp.f32 %v1840_v9 }
 0xe43   : > { %v1843_v15 = vpop.xlane.xlu1 %1842 }
 0xe44   : > { %3080 = vrcp.f32 %v1843_v15 }
 0xe45   : > { %v1846_v19 = vpop.xlane.xlu0 %1845 }
 0xe46   : > { %3082 = vrcp.f32 %v1846_v19 }
 0xe47   : > { %v1741_v20 = vpop.xlane.xlu1 %1740 }
 0xe48   : > { %3084 = vrcp.f32 %v1741_v20 }
 0xe49   : > { %v1744_v23 = vpop.xlane.xlu0 %1743 }
 0xe4a   : > { %3086 = vrcp.f32 %v1744_v23 }
 0xe4b   : > { %v1747_v24 = vpop.xlane.xlu1 %1746 }
 0xe4c   : > { %v3079_v26 = vpop.eup %3078  ;;  %3088 = vrcp.f32 %v1747_v24 }
 0xe4d   : > { %v1848_v30 = vmul.f32 %v3079_v26, %v3067_v58 }
 0xe4e   : > { %v3081_v29 = vpop.eup %3080 }
 0xe4f   : > { %v1850_v11 = vmul.f32 %v3081_v29, %v3069_v61 }
 0xe50   : > { %v3083_v12 = vpop.eup %3082 }
 0xe51   : > { %v1852_v14 = vmul.f32 %v3083_v12, %v3071_v60  ;;  %v1856_v31 = vpack.c.bf16 %v1850_v11, %v1848_v30 }
 0xe52   : > { %v3085_v16 = vpop.eup %3084 }
 0xe53   : > { %2900 = vmatprep.mubr.msk.bf16.mxu0 %vm761_vm8, %v1856_v31  ;;  %v1857_v32 = vpack.c.bf16 %v1852_v14, %v1852_v14  ;;  %v1749_v35 = vmul.f32 %v3085_v16, %v3073_v1 }
 0xe54   : > { %v3087_v18 = vpop.eup %3086 }
 0xe55   : > { %2901 = vmatmul.mubr.msk.bf16.vlgmr.msra.gmra.mrb[32].mxu0 %vm761_vm8, %v1857_v32  ;;  %v1751_v36 = vmul.f32 %v3087_v18, %v3075_v3 }
 0xe56   : > { %2905 = vmatpush3.bf16.msra.mxu0 %v3477_v63  ;;  %v3089_v38 = vpop.eup %3088 }
 0xe57   : > { %2967 = vmatprep.subr.msk.bf16.mxu0 %vm907_vm6, %v1760_v34  ;;  %v1757_v37 = vpack.c.bf16 %v1751_v36, %v1749_v35  ;;  %v1753_v5 = vmul.f32 %v3089_v38, %v3077_v41  ;;  %v3006_v34 = vld [vmem:[%s3643_s3 + $0xa0] sm:$0xff]   ;;  %v3007_v35 = vld [vmem:[%s3643_s3 + $0xa8] sm:$0xff]   ;;  %v3008_v36 = vld [vmem:[%s3643_s3 + $0xb0] sm:$0xff]  }
 0xe58   : > { %v2641_v38 = vld [vmem:[%s3646_s6 + $0x1] ss:$0 sm:$0xff] }
 0xe59   : > { %2908 = vmatprep.mubr.msk.bf16.mxu0 %vm761_vm8, %v1757_v37  ;;  %v1758_v39 = vpack.c.bf16 %v1753_v5, %v1753_v5  ;;  %v3009_v37 = vld [vmem:[%s3643_s3 + $0xb8] sm:$0xff]  }
 0xe5a   : > { %2907 = vmatpush3.bf16.msra.mxu0 %v1924_v10 }
 0xe5b   : > { %2928 = vmatprep.subr.bf16.mxu0 %v3006_v34 }
 0xe61   : > { %2909 = vmatmul.mubr.msk.bf16.vlgmr.msra.gmra.mrb[32].mxu0 %vm761_vm8, %v1758_v39 }
 0xe62   : > { %2929 = vmatpush3.bf16.msra.mxu0 %v3006_v34 }
 0xe63   : > { %2930 = vmatprep.subr.bf16.mxu0 %v3007_v35 }
 0xe66   : > { %2931 = vmatpush3.bf16.msra.mxu0 %v3007_v35 }
 0xe67   : > { %2932 = vmatprep.subr.bf16.mxu0 %v3008_v36 }
 0xe6a   : > { %2933 = vmatpush3.bf16.msra.mxu0 %v3008_v36 }
 0xe6b   : > { %2934 = vmatprep.subr.bf16.mxu0 %v3009_v37 }
 0xe6e   : > { %2935 = vmatpush3.bf16.msra.mxu0 %v3009_v37 }
 0xf34   : > { %v2910_v63 = vpop.f32.mrb[32].mxu0 }
 0xf35   : > { %v1960_v40 = vpop.f32.mrb[33].mxu0  ;;  %v1979_v8 = vpack.c.bf16 %v2910_v63, %v2910_v63 }
 0xf36   : > { %v2911_v42 = vpop.f32.mrb[34].mxu0 }
 0xf37   : > { %v1963_v7 = vpop.f32.mrb[35].mxu0 }
 0xf38   : > { %v1978_v43 = vpack.c.bf16 %v1963_v7, %v1960_v40 }
 0xf3a   : > { %2916 = vmatprep.mubr.msk.bf16.mxu1 %vm438_vm1, %v1978_v43 }
 0xf3b   : > { %2917 = vmatmul.mubr.msk.bf16.vlgmr.msra.gmra.mrb[28].mxu1 %vm438_vm1, %v1979_v8 }
 0xf3c   : > { %2921 = vmatpush3.bf16.msra.mxu1 %v3004_v6 }
 0xf3d   : > { %2922 = vmatprep.subr.bf16.mxu1 %v3005_v33 }
 0xf40   : > { %2923 = vmatpush3.bf16.msra.mxu1 %v3005_v33 }
0x100e   : > { %v2918_v17 = vpop.f32.mrb[28].mxu1 }
0x100f   : > { %v2032_v45 = vpop.f32.mrb[29].mxu1  ;;  %v2048_v47 = vadd.f32 %v2918_v17, %v3420_v48 }
0x1010   : > { %v2046_v50 = vadd.f32 %v2032_v45, %v3417_v46  ;;  %v2919_v52 = vpop.f32.mrb[30].mxu1 }
0x1011   : > { %v2035_v51 = vpop.f32.mrb[31].mxu1  ;;  %v3541_v53 = vadd.f32 %v2635_v44, %v2048_v47 }
0x1012   : > { %v3538_v25 = vadd.f32 %v2635_v44, %v2046_v50  ;;  %v2047_v27 = vadd.f32 %v2035_v51, %v3422_v49 }
0x1013   : > { %v2063_v46 = vsel %vm438_vm1, %v3541_v53, 0.0 }
0x1014   : > { %v3543_v54 = vadd.f32 %v2635_v44, %v2047_v27  ;;  %v2057_v28 = vsel %vm438_vm1, %v3538_v25, 0.0 }
0x1015   : > { %2058 = vadd.xlane.f32.xlu0 %v2057_v28 }
0x1016   : > { %v2060_v55 = vsel %vm438_vm1, %v3543_v54, 0.0 }
0x1017   : > { %2061 = vadd.xlane.f32.xlu1 %v2060_v55 }
0x1019   : > { %2064 = vadd.xlane.f32.xlu0 %v2063_v46 }
0x10a2   : > { %v2059_v48 = vpop.xlane.xlu0 %2058 }
0x10a3   : > { %v2066_v56 = vmul.f32 0.03125, %v2059_v48 }
0x10a4   : > { %v2062_v57 = vpop.xlane.xlu1 %2061 }
0x10a5   : > { %v2069_v49 = vsub.f32 %v3538_v25, %v2066_v56  ;;  %v2067_v58 = vmul.f32 0.03125, %v2062_v57 }
0x10a6   : > { %v2065_v59 = vpop.xlane.xlu0 %2064 }
0x10a7   : > { %v2070_v61 = vsub.f32 %v3543_v54, %v2067_v58  ;;  %v2068_v62 = vmul.f32 0.03125, %v2065_v59  ;;  %v2072_v60 = vmul.f32 %v2069_v49, %v2069_v49 }
0x10a9   : > { %v2071_v0 = vsub.f32 %v3541_v53, %v2068_v62  ;;  %v2075_v1 = vsel %vm438_vm1, %v2072_v60, 0.0  ;;  %v2073_v2 = vmul.f32 %v2070_v61, %v2070_v61 }
0x10aa   : > { %2076 = vadd.xlane.f32.xlu1 %v2075_v1 }
0x10ab   : > { %v2078_v3 = vsel %vm438_vm1, %v2073_v2, 0.0  ;;  %v2074_v4 = vmul.f32 %v2071_v0, %v2071_v0 }
0x10ac   : > { %2079 = vadd.xlane.f32.xlu0 %v2078_v3 }
0x10ad   : > { %v2081_v41 = vsel %vm438_vm1, %v2074_v4, 0.0 }
0x10ae   : > { %2082 = vadd.xlane.f32.xlu1 %v2081_v41 }
0x1137   : > { %v2077_v9 = vpop.xlane.xlu1 %2076 }
0x1138   : > { %v2084_v15 = vmul.f32 0.03125, %v2077_v9 }
0x1139   : > { %v2080_v19 = vpop.xlane.xlu0 %2079 }
0x113a   : > { %v2087_v20 = vadd.f32 1e-12, %v2084_v15  ;;  %v2085_v23 = vmul.f32 0.03125, %v2080_v19 }
0x113b   : > { %v2083_v24 = vpop.xlane.xlu1 %2082 }
0x113c   : > { %3090 = vrsqrt.f32 %v2087_v20  ;;  %v2088_v26 = vadd.f32 1e-12, %v2085_v23  ;;  %v2086_v29 = vmul.f32 0.03125, %v2083_v24 }
0x113e   : > { %3092 = vrsqrt.f32 %v2088_v26  ;;  %v2089_v30 = vadd.f32 1e-12, %v2086_v29 }
0x1140   : > { %3094 = vrsqrt.f32 %v2089_v30 }
0x1146   : > { %v3091_v11 = vpop.eup %3090 }
0x1147   : > { %v2093_v13 = vmul.f32 %v3091_v11, %v2069_v49 }
0x1148   : > { %v3093_v12 = vpop.eup %3092 }
0x1149   : > { %v2094_v14 = vmul.f32 %v3093_v12, %v2070_v61 }
0x114a   : > { %v3095_v31 = vpop.eup %3094 }
0x114b   : > { %v2101_v16 = vpack.c.bf16 %v2094_v14, %v2093_v13  ;;  %v2095_v32 = vmul.f32 %v3095_v31, %v2071_v0 }
0x114d   : > { %2924 = vmatprep.mubr.msk.bf16.mxu1 %vm438_vm1, %v2101_v16  ;;  %v2102_v18 = vpack.c.bf16 %v2095_v32, %v2095_v32 }
0x114f   : > { %2925 = vmatmul.mubr.msk.bf16.vlgmr.msra.gmra.mrb[32].mxu1 %vm438_vm1, %v2102_v18 }
0x1222   : > { %v2926_v10 = vpop.f32.mrb[32].mxu1 }
0x1223   : > { %v3580_v5 = vadd.f32 %v2926_v10, %v2641_v38  ;;  %v2163_v39 = vpop.f32.mrb[33].mxu1 }
0x1224   : > { %v3582_v22 = vadd.f32 %v2641_v38, %v2163_v39  ;;  %v2927_v63 = vpop.f32.mrb[34].mxu1 }
0x1225   : > { %v3585_v40 = vmul.f32 0.70710677, %v3580_v5  ;;  %v2166_v42 = vpop.f32.mrb[35].mxu1 }
0x1226   : > { %v3588_v7 = vmul.f32 0.70710677, %v3582_v22  ;;  %v3590_v43 = vadd.f32 %v2641_v38, %v2166_v42 }
0x1227   : > { %v2191_v8 = vand.u32 2147483647, %v3585_v40  ;;  %vm2185_vm13 = vcmp.ge.f32.partialorder %v3585_v40, 0.0 }
0x1228   : > { %v2189_v17 = vand.u32 2147483647, %v3588_v7  ;;  %v3595_v45 = vmul.f32 0.70710677, %v3590_v43  ;;  %vm2183_vm14 = vcmp.ge.f32.partialorder %v3588_v7, 0.0 }
0x1229   : > { %v2194_v44 = vmul.f32 0.3275911, %v2191_v8  ;;  %v2233_v55 = vsub.f32 0.0, %v2191_v8 }
0x122a   : > { %v2192_v47 = vmul.f32 0.3275911, %v2189_v17  ;;  %v2190_v52 = vand.u32 2147483647, %v3595_v45  ;;  %v2231_v46 = vsub.f32 0.0, %v2189_v17  ;;  %vm2184_vm15 = vcmp.ge.f32.partialorder %v3595_v45, 0.0 }
0x122b   : > { %v2197_v50 = vadd.f32 1.0, %v2194_v44  ;;  %v2236_v56 = vmul.f32 %v2233_v55, %v2191_v8  ;;  %v2188_v8 = vsel %vm2185_vm13, 1.0, %v3124_v21  ;;  %v2179_v55 = vmul.f32 0.5, %v3580_v5  ;;  %v2661_v5 = vld [vmem:[%s3645_s5 + $0xc] ss:$0 sm:$0xff] }
0x122c   : > { %v2195_v51 = vadd.f32 1.0, %v2192_v47  ;;  %v2193_v27 = vmul.f32 0.3275911, %v2190_v52  ;;  %v2232_v57 = vsub.f32 0.0, %v2190_v52  ;;  %v2234_v59 = vmul.f32 %v2231_v46, %v2189_v17 }
0x122d   : > { %3096 = vrcp.f32 %v2197_v50  ;;  %v2241_v0 = vmul.f32 1.442695, %v2236_v56  ;;  %v2186_v47 = vsel %vm2183_vm14, 1.0, %v3124_v21  ;;  %v2177_v46 = vmul.f32 0.5, %v3582_v22 }
0x122e   : > { %3098 = vrcp.f32 %v2195_v51  ;;  %v2196_v28 = vadd.f32 1.0, %v2193_v27  ;;  %v2235_v2 = vmul.f32 %v2232_v57, %v2190_v52  ;;  %v2237_v4 = vmul.f32 1.442695, %v2234_v59 }
0x122f   : > { %v2187_v27 = vsel %vm2184_vm15, 1.0, %v3124_v21 }
0x1230   : > { %3100 = vrcp.f32 %v2196_v28  ;;  %v2239_v19 = vmul.f32 1.442695, %v2235_v2 }
0x1231   : > { %3102 = vpow2.f32 %v2241_v0 }
0x1232   : > { %3104 = vpow2.f32 %v2237_v4 }
0x1233   : > { %3106 = vpow2.f32 %v2239_v19 }
0x1237   : > { %v3097_v48 = vpop.eup %3096 }
0x1238   : > { %v3099_v49 = vpop.eup %3098  ;;  %v2206_v58 = vmul.f32 1.0614054, %v3097_v48 }
0x1239   : > { %v2204_v61 = vmul.f32 1.0614054, %v3099_v49 }
0x123a   : > { %v2209_v62 = vadd.f32 -1.4531521, %v2206_v58  ;;  %v3101_v60 = vpop.eup %3100 }
0x123b   : > { %v2207_v1 = vadd.f32 -1.4531521, %v2204_v61  ;;  %v2205_v41 = vmul.f32 1.0614054, %v3101_v60  ;;  %v3103_v34 = vpop.eup %3102 }
0x123c   : > { %v2212_v3 = vmul.f32 %v3097_v48, %v2209_v62  ;;  %v3105_v36 = vpop.eup %3104 }
0x123d   : > { %v2210_v6 = vmul.f32 %v3099_v49, %v2207_v1  ;;  %v2208_v9 = vadd.f32 -1.4531521, %v2205_v41  ;;  %v3107_v42 = vpop.eup %3106 }
0x123e   : > { %v2215_v33 = vadd.f32 1.4214138, %v2212_v3 }
0x123f   : > { %v2213_v15 = vadd.f32 1.4214138, %v2210_v6  ;;  %v2211_v23 = vmul.f32 %v3101_v60, %v2208_v9 }
0x1240   : > { %v2218_v20 = vmul.f32 %v3097_v48, %v2215_v33 }
0x1241   : > { %v2216_v24 = vmul.f32 %v3099_v49, %v2213_v15  ;;  %v2214_v29 = vadd.f32 1.4214138, %v2211_v23 }
0x1242   : > { %v2221_v26 = vadd.f32 -0.28449672, %v2218_v20 }
0x1243   : > { %v2219_v30 = vadd.f32 -0.28449672, %v2216_v24  ;;  %v2217_v12 = vmul.f32 %v3101_v60, %v2214_v29 }
0x1244   : > { %v2224_v11 = vmul.f32 %v3097_v48, %v2221_v26 }
0x1245   : > { %v2222_v13 = vmul.f32 %v3099_v49, %v2219_v30  ;;  %v2220_v31 = vadd.f32 -0.28449672, %v2217_v12 }
0x1246   : > { %v2227_v14 = vadd.f32 0.2548296, %v2224_v11 }
0x1247   : > { %v2225_v16 = vadd.f32 0.2548296, %v2222_v13  ;;  %v2223_v18 = vmul.f32 %v3101_v60, %v2220_v31  ;;  %v3010_v13 = vld [vmem:[%s3647_s7] sm:$0xff]  }
0x1248   : > { %v2230_v32 = vmul.f32 %v3097_v48, %v2227_v14  ;;  %v2178_v48 = vmul.f32 0.5, %v3590_v43  ;;  %2940 = vmatprep.subr.bf16.mxu1 %v3010_v13  ;;  %v3011_v14 = vld [vmem:[%s3647_s7 + $0x8] sm:$0xff]  }
0x1249   : > { %v2228_v35 = vmul.f32 %v3099_v49, %v2225_v16  ;;  %v2226_v38 = vadd.f32 0.2548296, %v2223_v18  ;;  %2941 = vmatpush3.bf16.msra.mxu1 %v3010_v13 }
0x124a   : > { %v2245_v37 = vmul.f32 %v3103_v34, %v2230_v32  ;;  %2942 = vmatprep.subr.bf16.mxu1 %v3011_v14 }
0x124b   : > { %v2243_v10 = vmul.f32 %v3105_v36, %v2228_v35  ;;  %v2229_v63 = vmul.f32 %v3101_v60, %v2226_v38 }
0x124c   : > { %v2248_v39 = vsub.f32 1.0, %v2245_v37 }
0x124d   : > { %v2246_v17 = vsub.f32 1.0, %v2243_v10  ;;  %v2244_v50 = vmul.f32 %v3107_v42, %v2229_v63  ;;  %2943 = vmatpush3.bf16.msra.mxu1 %v3011_v14 }
0x124e   : > { %v2251_v44 = vmul.f32 %v2248_v39, %v2188_v8 }
0x124f   : > { %v2249_v52 = vmul.f32 %v2246_v17, %v2186_v47  ;;  %v2247_v51 = vsub.f32 1.0, %v2244_v50  ;;  %v2662_v50 = vld [vmem:[%s3648_s8] ss:$0 sm:$0xff] }
0x1250   : > { %v2254_v40 = vadd.f32 1.0, %v2251_v44 }
0x1251   : > { %v2252_v28 = vadd.f32 1.0, %v2249_v52  ;;  %v2250_v7 = vmul.f32 %v2247_v51, %v2187_v27 }
0x1252   : > { %v2257_v57 = vmul.f32 %v2254_v40, %v2179_v55 }
0x1253   : > { %v2253_v56 = vadd.f32 1.0, %v2250_v7  ;;  %v2255_v49 = vmul.f32 %v2252_v28, %v2177_v46 }
0x1254   : > { %v2267_v45 = vpack.c.bf16 %v2257_v57, %v2257_v57 }
0x1255   : > { %v2256_v58 = vmul.f32 %v2253_v56, %v2178_v48 }
0x1257   : > { %v2266_v59 = vpack.c.bf16 %v2256_v58, %v2255_v49 }
0x1259   : > { %2936 = vmatprep.mubr.msk.bf16.mxu0 %vm1332_vm12, %v2266_v59 }
0x125a   : > { %2937 = vmatmul.mubr.msk.bf16.vlgmr.msra.gmra.mrb[36].mxu0 %vm1332_vm12, %v2267_v45 }
0x132d   : > { %v2938_v61 = vpop.f32.mrb[36].mxu0 }
0x132e   : > { %v2332_v21 = vpop.f32.mrb[37].mxu0  ;;  %v2348_v22 = vadd.f32 %v2938_v61, %v3541_v53 }
0x132f   : > { %v2346_v43 = vadd.f32 %v2332_v21, %v3538_v25  ;;  %v2939_v62 = vpop.f32.mrb[38].mxu0 }
0x1330   : > { %v2335_v60 = vpop.f32.mrb[39].mxu0  ;;  %v2356_v4 = vadd.f32 %v2661_v5, %v2348_v22 }
0x1331   : > { %v2347_v0 = vadd.f32 %v2335_v60, %v3543_v54  ;;  %v2354_v1 = vadd.f32 %v2661_v5, %v2346_v43 }
0x1332   : > { %v2363_v6 = vsel %vm438_vm1, %v2356_v4, 0.0 }
0x1333   : > { %v2357_v2 = vsel %vm438_vm1, %v2354_v1, 0.0  ;;  %v2355_v3 = vadd.f32 %v2661_v5, %v2347_v0 }
0x1334   : > { %2358 = vadd.xlane.f32.xlu0 %v2357_v2 }
0x1335   : > { %v2360_v41 = vsel %vm438_vm1, %v2355_v3, 0.0 }
0x1336   : > { %2361 = vadd.xlane.f32.xlu1 %v2360_v41 }
0x1338   : > { %2364 = vadd.xlane.f32.xlu0 %v2363_v6 }
0x13c1   : > { %v2359_v33 = vpop.xlane.xlu0 %2358 }
0x13c2   : > { %v2366_v53 = vmul.f32 0.03125, %v2359_v33 }
0x13c3   : > { %v2362_v9 = vpop.xlane.xlu1 %2361 }
0x13c4   : > { %v2369_v25 = vsub.f32 %v2354_v1, %v2366_v53  ;;  %v2367_v15 = vmul.f32 0.03125, %v2362_v9 }
0x13c5   : > { %v2365_v19 = vpop.xlane.xlu0 %2364 }
0x13c6   : > { %v2370_v20 = vsub.f32 %v2355_v3, %v2367_v15  ;;  %v2368_v54 = vmul.f32 0.03125, %v2365_v19  ;;  %v2372_v23 = vmul.f32 %v2369_v25, %v2369_v25 }
0x13c8   : > { %v2371_v24 = vsub.f32 %v2356_v4, %v2368_v54  ;;  %v2375_v26 = vsel %vm438_vm1, %v2372_v23, 0.0  ;;  %v2373_v29 = vmul.f32 %v2370_v20, %v2370_v20 }
0x13c9   : > { %2376 = vadd.xlane.f32.xlu1 %v2375_v26 }
0x13ca   : > { %v2378_v30 = vsel %vm438_vm1, %v2373_v29, 0.0  ;;  %v2374_v11 = vmul.f32 %v2371_v24, %v2371_v24 }
0x13cb   : > { %2379 = vadd.xlane.f32.xlu0 %v2378_v30 }
0x13cc   : > { %v2381_v12 = vsel %vm438_vm1, %v2374_v11, 0.0 }
0x13cd   : > { %2382 = vadd.xlane.f32.xlu1 %v2381_v12 }
0x1456   : > { %v2377_v31 = vpop.xlane.xlu1 %2376 }
0x1457   : > { %v2384_v16 = vmul.f32 0.03125, %v2377_v31 }
0x1458   : > { %v2380_v32 = vpop.xlane.xlu0 %2379 }
0x1459   : > { %v2387_v18 = vadd.f32 1e-12, %v2384_v16  ;;  %v2385_v34 = vmul.f32 0.03125, %v2380_v32 }
0x145a   : > { %v2383_v35 = vpop.xlane.xlu1 %2382 }
0x145b   : > { %3108 = vrsqrt.f32 %v2387_v18  ;;  %v2388_v36 = vadd.f32 1e-12, %v2385_v34  ;;  %v2386_v37 = vmul.f32 0.03125, %v2383_v35 }
0x145d   : > { %3110 = vrsqrt.f32 %v2388_v36  ;;  %v2389_v38 = vadd.f32 1e-12, %v2386_v37 }
0x145f   : > { %3112 = vrsqrt.f32 %v2389_v38 }
0x1465   : > { %v3109_v10 = vpop.eup %3108 }
0x1466   : > { %v2393_v63 = vmul.f32 %v3109_v10, %v2369_v25 }
0x1467   : > { %v3111_v39 = vpop.eup %3110 }
0x1468   : > { %v2394_v42 = vmul.f32 %v3111_v39, %v2370_v20 }
0x1469   : > { %v3113_v8 = vpop.eup %3112 }
0x146a   : > { %v2395_v17 = vmul.f32 %v3113_v8, %v2371_v24  ;;  %v2400_v44 = vpack.c.bf16 %v2394_v42, %v2393_v63 }
0x146c   : > { %2944 = vmatprep.mubr.msk.bf16.mxu1 %vm438_vm1, %v2400_v44  ;;  %v2401_v47 = vpack.c.bf16 %v2395_v17, %v2395_v17 }
0x146e   : > { %2945 = vmatmul.mubr.msk.bf16.vlgmr.msra.gmra.mrb[36].mxu1 %vm438_vm1, %v2401_v47 }
0x1541   : > { %v2946_v52 = vpop.f32.mrb[36].mxu1 }
0x1542   : > { %v2470_v51 = vadd.f32 %v2946_v52, %v2662_v50  ;;  %v2461_v40 = vpop.f32.mrb[37].mxu1 }
0x1543   : > { %v2462_v27 = vadd.f32 %v2662_v50, %v2461_v40  ;;  %v2947_v28 = vpop.f32.mrb[38].mxu1 }
0x1544   : > { %2477 = vst [vmem:[%s334_s26 + $0x10] sm:$0xff] %v2470_v51  ;;  %v2464_v7 = vpop.f32.mrb[39].mxu1 }
0x1545   : > { %2475 = vst [vmem:[%s334_s26] sm:$0xff] %v2462_v27  ;;  %v2465_v55 = vadd.f32 %v2662_v50, %v2464_v7 }
0x1547   : > { %2476 = vst [vmem:[%s334_s26 + $0x8] sm:$0xff] %v2465_v55 }
0x1548 PF: > { %s19_s30 = sadd.s32 1, %s3120_s30  }
0x1549   : > { %p16_p4 = scmp.ge.s32.totalorder %s19_s30, 4  }
0x154b   :  { %18 = sbr.rel (!%p16_p4) target bundleno = 1 (0x1), region = 90 }

</bundles_post_ra>
